<compile_context>
chip_gen: v7x
topology: tpu7x:2x2x1
jax: 0.10.0
libtpu: 0.0.40
codegen_flags: <defaults>
</compile_context>

<pallas_src>
import math

import jax
import jax.numpy as jnp
from jax import lax
from jax.experimental import pallas as pl
from jax.experimental.pallas import tpu as pltpu


# --------------------------------------------------------------------------- #
# Kernel 1: fused theta/phi/g 1x1 convs  ==  (rows, C) @ (C, 3*Ci) + bias
# --------------------------------------------------------------------------- #
def _proj_kernel(x_ref, w_ref, b_ref, o_ref):
    h = jnp.dot(x_ref[...], w_ref[...], preferred_element_type=jnp.float32)
    h = h + b_ref[...]                     # bias add in f32 (no bf16 VPU on v5e)
    o_ref[...] = h.astype(o_ref.dtype)     # bf16 out: only feeds matmuls / maxpool


def fused_projections(x_flat, w_cat, b_cat, tile_rows=256):
    """x_flat: (R, C) bf16 ; w_cat: (C, Co) bf16 ; b_cat: (1, Co) f32 -> (R, Co) bf16."""
    R, C = x_flat.shape
    Co = w_cat.shape[1]

    # Lane-dense output: pad fused width up to a multiple of 128 with zero
    # weight/bias columns so stores are unmasked vst (pad sliced off below).
    Cop = -(-Co // 128) * 128
    if Cop != Co:
        w_cat = jnp.pad(w_cat, ((0, 0), (0, Cop - Co)))
        b_cat = jnp.pad(b_cat, ((0, 0), (0, Cop - Co)))

    tile_rows = min(tile_rows, -(-R // 8) * 8)     # multiple of 8 sublanes
    Rp = -(-R // tile_rows) * tile_rows
    if Rp != R:
        x_flat = jnp.pad(x_flat, ((0, Rp - R), (0, 0)))

    out = pl.pallas_call(
        _proj_kernel,
        out_shape=jax.ShapeDtypeStruct((Rp, Cop), jnp.bfloat16),
        grid_spec=pltpu.PrefetchScalarGridSpec(
            num_scalar_prefetch=0,
            grid=(Rp // tile_rows,),
            in_specs=[
                pl.BlockSpec((tile_rows, C), lambda i: (i, 0)),
                pl.BlockSpec((C, Cop), lambda i: (0, 0)),
                pl.BlockSpec((1, Cop), lambda i: (0, 0)),
            ],
            out_specs=pl.BlockSpec((tile_rows, Cop), lambda i: (i, 0)),
        ),
        compiler_params=pltpu.CompilerParams(dimension_semantics=("parallel",)),
    )(x_flat, w_cat, b_cat)
    return out[:R, :Co]


# --------------------------------------------------------------------------- #
# Kernel 2: per-batch  softmax(theta @ phi^T) @ g  ->  W-conv(+folded BN) -> +x
# --------------------------------------------------------------------------- #
def _nonlocal_attn_kernel(theta_ref, phi_ref, g_ref, x_ref, w_ref, b_ref, o_ref):
    theta = theta_ref[0]                                    # (N, Ci) bf16
    phi = phi_ref[0]                                        # (M, Ci) bf16
    g = g_ref[0]                                            # (M, Ci) bf16

    # f = theta @ phi^T  (contract Ci of both; avoids explicit transpose)
    f = lax.dot_general(theta, phi, (((1,), (1,)), ((), ())),
                        preferred_element_type=jnp.float32)  # (N, M) f32

    # row softmax over keys, all elementwise in f32; reciprocal on EUP slot
    f_max = jnp.max(f, axis=-1, keepdims=True)
    p = jnp.exp(f - f_max)
    inv_l = pl.reciprocal(jnp.sum(p, axis=-1, keepdims=True), approx=True)
    p = p * inv_l

    # y = softmax(f) @ g_x
    y = jnp.dot(p.astype(jnp.bfloat16), g,
                preferred_element_type=jnp.float32)          # (N, Ci) f32

    # W_y = y @ W (BN folded) + b ; z = W_y + x
    wy = jnp.dot(y.astype(jnp.bfloat16), w_ref[...],
                 preferred_element_type=jnp.float32) + b_ref[...]
    o_ref[0] = wy + x_ref[0]                                 # f32 residual add


def nonlocal_attention(theta_x, phi_x, g_x, x_res, w_W, b_W):
    """theta_x: (B,N,Ci) bf16, phi_x/g_x: (B,M,Ci) bf16, x_res: (B,N,C) f32 -> (B,N,C) f32."""
    B, N, Ci = theta_x.shape
    M = phi_x.shape[1]
    C = x_res.shape[2]
    return pl.pallas_call(
        _nonlocal_attn_kernel,
        out_shape=jax.ShapeDtypeStruct((B, N, C), jnp.float32),
        grid_spec=pltpu.PrefetchScalarGridSpec(
            num_scalar_prefetch=0,
            grid=(B,),
            in_specs=[
                pl.BlockSpec((1, N, Ci), lambda b: (b, 0, 0)),
                pl.BlockSpec((1, M, Ci), lambda b: (b, 0, 0)),
                pl.BlockSpec((1, M, Ci), lambda b: (b, 0, 0)),
                pl.BlockSpec((1, N, C), lambda b: (b, 0, 0)),
                pl.BlockSpec((Ci, C), lambda b: (0, 0)),
                pl.BlockSpec((1, C), lambda b: (0, 0)),
            ],
            out_specs=pl.BlockSpec((1, N, C), lambda b: (b, 0, 0)),
        ),
        compiler_params=pltpu.CompilerParams(dimension_semantics=("parallel",)),
    )(theta_x, phi_x, g_x, x_res, w_W, b_W)


# --------------------------------------------------------------------------- #
# Forward pass (embedded_gaussian, dimension=3, sub_sample=True, bn_layer=True)
# --------------------------------------------------------------------------- #
def nonlocal_block_forward(params, x):
    """x: (B, C, T, H, W) float32 -> z: (B, C, T, H, W) float32."""
    B, C, T, H, W = x.shape
    w_tpg, b_tpg = params["w_tpg"], params["b_tpg"]      # (C, 3*Ci) bf16, (1, 3*Ci) f32
    w_W, b_W = params["w_W"], params["b_W"]              # (Ci, C) bf16,  (1, C) f32
    Ci = w_W.shape[0]
    N = T * H * W

    # channels-last flattened positions (all layout plumbing kept in the wrapper)
    x_flat = jnp.transpose(x, (0, 2, 3, 4, 1)).reshape(B * N, C)            # (B*N, C) f32

    proj = fused_projections(x_flat.astype(jnp.bfloat16), w_tpg, b_tpg)     # (B*N, 3*Ci) bf16
    theta_x = proj[:, :Ci].reshape(B, N, Ci)
    phi_full = proj[:, Ci:2 * Ci].reshape(B, T, H, W, Ci)
    g_full = proj[:, 2 * Ci:3 * Ci].reshape(B, T, H, W, Ci)

    # sub_sample=True: MaxPool3d(kernel_size=2) after phi and g (even dims assumed).
    def pool2(v):
        v = v.reshape(B, T // 2, 2, H // 2, 2, W // 2, 2, Ci)
        return jnp.max(v, axis=(2, 4, 6)).reshape(B, (T // 2) * (H // 2) * (W // 2), Ci)

    phi_x = pool2(phi_full)                                                  # (B, M, Ci) bf16
    g_x = pool2(g_full)                                                      # (B, M, Ci) bf16

    x_res = x_flat.reshape(B, N, C)                                          # f32 residual
    z = nonlocal_attention(theta_x, phi_x, g_x, x_res, w_W, b_W)             # (B, N, C) f32
    return jnp.transpose(z.reshape(B, T, H, W, C), (0, 4, 1, 2, 3))


# --------------------------------------------------------------------------- #
# Parameter init (synthetic; matches reference layer shapes, BN folded eval-mode)
# --------------------------------------------------------------------------- #
def init_params(key, in_channels, inter_channels=None, eps=1e-5):
    if inter_channels is None:
        inter_channels = max(in_channels // 2, 1)
    C, Ci = in_channels, inter_channels
    kt, kp, kg, kw, kbn = jax.random.split(key, 5)

    def kaiming(k, cin, cout):                      # kaiming_normal on a 1x1 conv
        return jax.random.normal(k, (cin, cout), jnp.float32) * math.sqrt(2.0 / cin)

    w_theta, w_phi, w_g = kaiming(kt, C, Ci), kaiming(kp, C, Ci), kaiming(kg, C, Ci)
    b_tpg = jnp.zeros((1, 3 * Ci), jnp.float32)     # conv biases init to 0 in reference

    # W conv + folded BatchNorm (eval mode, synthetic stats; see TODO at top of file)
    w_Wc = kaiming(kw, Ci, C)
    b_Wc = jnp.zeros((C,), jnp.float32)
    kgm, kbt = jax.random.split(kbn)
    gamma = jax.random.uniform(kgm, (C,), jnp.float32, 0.8, 1.2)
    beta = jax.random.uniform(kbt, (C,), jnp.float32, -0.1, 0.1)
    mean, var = jnp.zeros((C,), jnp.float32), jnp.ones((C,), jnp.float32)
    scale = gamma / jnp.sqrt(var + eps)
    w_W = w_Wc * scale[None, :]
    b_W = (b_Wc - mean) * scale + beta

    return {
        "w_tpg": jnp.concatenate([w_theta, w_phi, w_g], axis=1).astype(jnp.bfloat16),
        "b_tpg": b_tpg,
        "w_W": w_W.astype(jnp.bfloat16),
        "b_W": b_W.reshape(1, C),
    }


# --------------------------------------------------------------------------- #
if __name__ == "__main__":
    key = jax.random.PRNGKey(0)
    B, C, T, H, W = 2, 128, 4, 8, 8          # (b, c, t, h, w); inter_channels = 64
    kp, kx = jax.random.split(key)

    params = init_params(kp, C)
    x = jax.random.normal(kx, (B, C, T, H, W), jnp.float32)

    fwd = jax.jit(nonlocal_block_forward)
    z = jax.block_until_ready(fwd(params, x))

    assert z.shape == (B, C, T, H, W), z.shape
    assert bool(jnp.all(jnp.isfinite(z)))
    print("KERNEL_OK")
</pallas_src>

<mosaic_0001>
module attributes {stable_mosaic.version = 11 : i64} {
  func.func @_proj_kernel(%arg0: i32, %arg1: memref<256x128xbf16, #tpu.memory_space<vmem>>, %arg2: memref<128x256xbf16, #tpu.memory_space<vmem>>, %arg3: memref<1x256xf32, #tpu.memory_space<vmem>>, %arg4: memref<256x256xbf16, #tpu.memory_space<vmem>>) attributes {dimension_semantics = [#tpu.dimension_semantics<parallel>], iteration_bounds = array<i64: 2>, scalar_prefetch = 0 : i64, scratch_operands = 0 : i64, tpu.core_type = #tpu.core_type<tc>, window_params = [{transform_indices = @transform_0, window_bounds = array<i64: 256, 128>}, {pipeline_mode = #tpu.pipeline_mode<synchronous>, transform_indices = @transform_1, window_bounds = array<i64: 128, 256>}, {pipeline_mode = #tpu.pipeline_mode<synchronous>, transform_indices = @transform_2, window_bounds = array<i64: 1, 256>}, {transform_indices = @transform_3, window_bounds = array<i64: 256, 256>}]} {
    %c0 = arith.constant 0 : index
    %c0_0 = arith.constant 0 : index
    %0 = vector.load %arg1[%c0, %c0_0] : memref<256x128xbf16, #tpu.memory_space<vmem>>, vector<256x128xbf16>
    %c0_1 = arith.constant 0 : index
    %c0_2 = arith.constant 0 : index
    %1 = vector.load %arg2[%c0_1, %c0_2] : memref<128x256xbf16, #tpu.memory_space<vmem>>, vector<128x256xbf16>
    %cst = arith.constant dense<0.000000e+00> : vector<256x256xf32>
    %2 = tpu.matmul %0, %1, %cst {dimension_numbers = #tpu.dot_dimension_numbers<[1], [0], [0], [1], [0, 0, 1, 1], [], []>} : vector<256x128xbf16>, vector<128x256xbf16>, vector<256x256xf32> -> vector<256x256xf32>
    %c0_3 = arith.constant 0 : index
    %c0_4 = arith.constant 0 : index
    %3 = vector.load %arg3[%c0_3, %c0_4] : memref<1x256xf32, #tpu.memory_space<vmem>>, vector<1x256xf32>
    %4 = vector.broadcast %3 : vector<1x256xf32> to vector<256x256xf32>
    %5 = arith.addf %2, %4 : vector<256x256xf32>
    %6 = arith.truncf %5 : vector<256x256xf32> to vector<256x256xbf16>
    %c0_5 = arith.constant 0 : index
    %c0_6 = arith.constant 0 : index
    %7 = vector.load %arg4[%c0_5, %c0_6] : memref<256x256xbf16, #tpu.memory_space<vmem>>, vector<256x256xbf16>
    tpu.vector_store %arg4[%c0_5, %c0_6], %6 {strides = array<i32>} : memref<256x256xbf16, #tpu.memory_space<vmem>>, vector<256x256xbf16>,
    return
  }
  func.func @transform_0(%arg0: i32) -> (i32, i32) {
    %c0_i32 = arith.constant 0 : i32
    %c0_i32_0 = arith.constant 0 : i32
    return %arg0, %c0_i32 : i32, i32
  }
  func.func @transform_1(%arg0: i32) -> (i32, i32) {
    %c0_i32 = arith.constant 0 : i32
    %c0_i32_0 = arith.constant 0 : i32
    %c0_i32_1 = arith.constant 0 : i32
    return %c0_i32, %c0_i32_0 : i32, i32
  }
  func.func @transform_2(%arg0: i32) -> (i32, i32) {
    %c0_i32 = arith.constant 0 : i32
    %c0_i32_0 = arith.constant 0 : i32
    %c0_i32_1 = arith.constant 0 : i32
    return %c0_i32, %c0_i32_0 : i32, i32
  }
  func.func @transform_3(%arg0: i32) -> (i32, i32) {
    %c0_i32 = arith.constant 0 : i32
    %c0_i32_0 = arith.constant 0 : i32
    return %arg0, %c0_i32 : i32, i32
  }
}

module attributes {stable_mosaic.version = 11 : i64} {
  func.func @_nonlocal_attn_kernel(%arg0: i32, %arg1: memref<1x256x64xbf16, #tpu.memory_space<vmem>>, %arg2: memref<1x32x64xbf16, #tpu.memory_space<vmem>>, %arg3: memref<1x32x64xbf16, #tpu.memory_space<vmem>>, %arg4: memref<1x256x128xf32, #tpu.memory_space<vmem>>, %arg5: memref<64x128xbf16, #tpu.memory_space<vmem>>, %arg6: memref<1x128xf32, #tpu.memory_space<vmem>>, %arg7: memref<1x256x128xf32, #tpu.memory_space<vmem>>) attributes {dimension_semantics = [#tpu.dimension_semantics<parallel>], iteration_bounds = array<i64: 2>, scalar_prefetch = 0 : i64, scratch_operands = 0 : i64, tpu.core_type = #tpu.core_type<tc>, window_params = [{transform_indices = @transform_0, window_bounds = array<i64: 1, 256, 64>}, {transform_indices = @transform_1, window_bounds = array<i64: 1, 32, 64>}, {transform_indices = @transform_2, window_bounds = array<i64: 1, 32, 64>}, {transform_indices = @transform_3, window_bounds = array<i64: 1, 256, 128>}, {pipeline_mode = #tpu.pipeline_mode<synchronous>, transform_indices = @transform_4, window_bounds = array<i64: 64, 128>}, {pipeline_mode = #tpu.pipeline_mode<synchronous>, transform_indices = @transform_5, window_bounds = array<i64: 1, 128>}, {transform_indices = @transform_6, window_bounds = array<i64: 1, 256, 128>}]} {
    %c0 = arith.constant 0 : index
    %c0_0 = arith.constant 0 : index
    %c0_1 = arith.constant 0 : index
    %0 = vector.load %arg1[%c0, %c0_0, %c0_1] : memref<1x256x64xbf16, #tpu.memory_space<vmem>>, vector<1x256x64xbf16>
    %1 = vector.shape_cast %0 : vector<1x256x64xbf16> to vector<256x64xbf16>
    %c0_2 = arith.constant 0 : index
    %c0_3 = arith.constant 0 : index
    %c0_4 = arith.constant 0 : index
    %2 = vector.load %arg2[%c0_2, %c0_3, %c0_4] : memref<1x32x64xbf16, #tpu.memory_space<vmem>>, vector<1x32x64xbf16>
    %3 = vector.shape_cast %2 : vector<1x32x64xbf16> to vector<32x64xbf16>
    %c0_5 = arith.constant 0 : index
    %c0_6 = arith.constant 0 : index
    %c0_7 = arith.constant 0 : index
    %4 = vector.load %arg3[%c0_5, %c0_6, %c0_7] : memref<1x32x64xbf16, #tpu.memory_space<vmem>>, vector<1x32x64xbf16>
    %5 = vector.shape_cast %4 : vector<1x32x64xbf16> to vector<32x64xbf16>
    %cst = arith.constant dense<0.000000e+00> : vector<256x32xf32>
    %6 = tpu.matmul %1, %3, %cst {dimension_numbers = #tpu.dot_dimension_numbers<[1], [1], [0], [0], [0, 0, 1, 0], [], []>} : vector<256x64xbf16>, vector<32x64xbf16>, vector<256x32xf32> -> vector<256x32xf32>
    %cst_8 = arith.constant dense<0xFF800000> : vector<256xf32>
    %7 = vector.multi_reduction <maximumf>, %6, %cst_8 [1] : vector<256x32xf32> to vector<256xf32>
    %8 = vector.shape_cast %7 : vector<256xf32> to vector<256x1xf32>
    %9 = vector.broadcast %8 : vector<256x1xf32> to vector<256x32xf32>
    %10 = arith.subf %6, %9 : vector<256x32xf32>
    %11 = math.exp %10 : vector<256x32xf32>
    %cst_9 = arith.constant dense<0.000000e+00> : vector<256xf32>
    %12 = vector.multi_reduction <add>, %11, %cst_9 [1] : vector<256x32xf32> to vector<256xf32>
    %13 = vector.shape_cast %12 : vector<256xf32> to vector<256x1xf32>
    %14 = tpu.reciprocal %13 {approx = true} : vector<256x1xf32> -> vector<256x1xf32>
    %15 = vector.broadcast %14 : vector<256x1xf32> to vector<256x32xf32>
    %16 = arith.mulf %11, %15 : vector<256x32xf32>
    %17 = arith.truncf %16 : vector<256x32xf32> to vector<256x32xbf16>
    %cst_10 = arith.constant dense<0.000000e+00> : vector<256x64xf32>
    %18 = tpu.matmul %17, %5, %cst_10 {dimension_numbers = #tpu.dot_dimension_numbers<[1], [0], [0], [1], [0, 0, 1, 1], [], []>} : vector<256x32xbf16>, vector<32x64xbf16>, vector<256x64xf32> -> vector<256x64xf32>
    %19 = arith.truncf %18 : vector<256x64xf32> to vector<256x64xbf16>
    %c0_11 = arith.constant 0 : index
    %c0_12 = arith.constant 0 : index
    %20 = vector.load %arg5[%c0_11, %c0_12] : memref<64x128xbf16, #tpu.memory_space<vmem>>, vector<64x128xbf16>
    %cst_13 = arith.constant dense<0.000000e+00> : vector<256x128xf32>
    %21 = tpu.matmul %19, %20, %cst_13 {dimension_numbers = #tpu.dot_dimension_numbers<[1], [0], [0], [1], [0, 0, 1, 1], [], []>} : vector<256x64xbf16>, vector<64x128xbf16>, vector<256x128xf32> -> vector<256x128xf32>
    %c0_14 = arith.constant 0 : index
    %c0_15 = arith.constant 0 : index
    %22 = vector.load %arg6[%c0_14, %c0_15] : memref<1x128xf32, #tpu.memory_space<vmem>>, vector<1x128xf32>
    %23 = vector.broadcast %22 : vector<1x128xf32> to vector<256x128xf32>
    %24 = arith.addf %21, %23 : vector<256x128xf32>
    %c0_16 = arith.constant 0 : index
    %c0_17 = arith.constant 0 : index
    %c0_18 = arith.constant 0 : index
    %25 = vector.load %arg4[%c0_16, %c0_17, %c0_18] : memref<1x256x128xf32, #tpu.memory_space<vmem>>, vector<1x256x128xf32>
    %26 = vector.shape_cast %25 : vector<1x256x128xf32> to vector<256x128xf32>
    %27 = arith.addf %24, %26 : vector<256x128xf32>
    %c0_19 = arith.constant 0 : index
    %c0_20 = arith.constant 0 : index
    %c0_21 = arith.constant 0 : index
    %28 = vector.load %arg7[%c0_19, %c0_20, %c0_21] : memref<1x256x128xf32, #tpu.memory_space<vmem>>, vector<1x256x128xf32>
    %29 = vector.shape_cast %28 : vector<1x256x128xf32> to vector<256x128xf32>
    %30 = vector.shape_cast %27 : vector<256x128xf32> to vector<1x256x128xf32>
    tpu.vector_store %arg7[%c0_19, %c0_20, %c0_21], %30 {strides = array<i32>} : memref<1x256x128xf32, #tpu.memory_space<vmem>>, vector<1x256x128xf32>,
    return
  }
  func.func @transform_0(%arg0: i32) -> (i32, i32, i32) {
    %c0_i32 = arith.constant 0 : i32
    %c0_i32_0 = arith.constant 0 : i32
    %c0_i32_1 = arith.constant 0 : i32
    return %arg0, %c0_i32, %c0_i32_0 : i32, i32, i32
  }
  func.func @transform_1(%arg0: i32) -> (i32, i32, i32) {
    %c0_i32 = arith.constant 0 : i32
    %c0_i32_0 = arith.constant 0 : i32
    %c0_i32_1 = arith.constant 0 : i32
    return %arg0, %c0_i32, %c0_i32_0 : i32, i32, i32
  }
  func.func @transform_2(%arg0: i32) -> (i32, i32, i32) {
    %c0_i32 = arith.constant 0 : i32
    %c0_i32_0 = arith.constant 0 : i32
    %c0_i32_1 = arith.constant 0 : i32
    return %arg0, %c0_i32, %c0_i32_0 : i32, i32, i32
  }
  func.func @transform_3(%arg0: i32) -> (i32, i32, i32) {
    %c0_i32 = arith.constant 0 : i32
    %c0_i32_0 = arith.constant 0 : i32
    %c0_i32_1 = arith.constant 0 : i32
    return %arg0, %c0_i32, %c0_i32_0 : i32, i32, i32
  }
  func.func @transform_4(%arg0: i32) -> (i32, i32) {
    %c0_i32 = arith.constant 0 : i32
    %c0_i32_0 = arith.constant 0 : i32
    %c0_i32_1 = arith.constant 0 : i32
    return %c0_i32, %c0_i32_0 : i32, i32
  }
  func.func @transform_5(%arg0: i32) -> (i32, i32) {
    %c0_i32 = arith.constant 0 : i32
    %c0_i32_0 = arith.constant 0 : i32
    %c0_i32_1 = arith.constant 0 : i32
    return %c0_i32, %c0_i32_0 : i32, i32
  }
  func.func @transform_6(%arg0: i32) -> (i32, i32, i32) {
    %c0_i32 = arith.constant 0 : i32
    %c0_i32_0 = arith.constant 0 : i32
    %c0_i32_1 = arith.constant 0 : i32
    return %arg0, %c0_i32, %c0_i32_0 : i32, i32, i32
  }
}

</mosaic_0001>

<bundles_post_ra>
// kernel: nonlocal_block_forward.2
= control target key start
LH: loop header
LB: loop body
LE: loop exit
PB: predicated region body
PF: predicated region fallthrough
CT: control target
= control target key end

     0   :  { %s1091_s12 = smov 0   ;;  %s1299_s0 = inlined_call_operand.vmem [shape: bf16[512,128], index: 0, kind: input, shape index: {}]   ;;  %s1300_s1 = inlined_call_operand.vmem [shape: bf16[128,256], index: 1, kind: input, shape index: {}]   ;;  %s1301_s2 = inlined_call_operand.vmem [shape: f32[1,256], index: 2, kind: input, shape index: {}]   ;;  %s1302_s3 = inlined_call_operand.vmem [shape: bf16[512,256], index: 3, kind: output, shape index: {}]  }
   0x1 LB: > { %s888_s13 = sadd.s32 4294967295, %s1068_s12   ;;  %p892_p0 = scmp.ge.s32.totalorder %s1068_s12, 1  ;;  %s1068_s12 = sphi %s1091_s12, %s13_s12  }
   0x2   : > { %p138_p1 = scmp.lt.s32.totalorder %s1068_s12, 3 }
   0x4   : > { %p139_p2 = pnand %p892_p0, %p138_p1 }
   0x5   : > { %v1022_v0 = vld [vmem:[%s1300_s1 + $0x4] ss:$8 sps:$4 sm:$0xff] (!%p139_p2)   ;;  %s893_s16 = sshll.u32 (!%p139_p2), %s888_s13, 5  ;;  %v1024_v1 = vld [vmem:[%s1300_s1] ss:$8 sps:$4 sm:$0xff] (!%p139_p2)   ;;  %v1070_v2 = vmov (!%p139_p2), 0   ;;  %v227_v33 = vlaneseq (!%p139_p2) }
   0x6   : > { %142 = sbr.rel (%p139_p2) target bundleno = 315 (0x13b), region = 32  ;;  %445 = vmatprep.mubr.bf16.mxu0 (!%p139_p2), %v1070_v2  ;;  %525 = vmatprep.mubr.bf16.mxu1 (!%p139_p2), %v1070_v2  ;;  %p164_p3 = scmp.lt.s32.totalorder (!%p139_p2), %s893_s16, 63  ;;  %v1025_v3 = vld [vmem:[%s1300_s1 + $0x14] ss:$8 sps:$4 sm:$0xff] (!%p139_p2)   ;;  %v1027_v4 = vld [vmem:[%s1300_s1 + $0x10] ss:$8 sps:$4 sm:$0xff] (!%p139_p2)  }
   0x7   : > { %413 = vmatprep.subr.bf16.mxu0 (!%p139_p2), %v1022_v0  ;;  %997 = vmatprep.subr.bf16.mxu1 (!%p139_p2), %v1022_v0  ;;  %v1028_v5 = vld [vmem:[%s1300_s1 + $0x24] ss:$8 sps:$4 sm:$0xff] (!%p139_p2)   ;;  %v1030_v6 = vld [vmem:[%s1300_s1 + $0x20] ss:$8 sps:$4 sm:$0xff] (!%p139_p2)   ;;  %v1031_v7 = vld [vmem:[%s1300_s1 + $0x34] ss:$8 sps:$4 sm:$0xff] (!%p139_p2)  }
   0x8   : > { %414 = vmatpush1.bf16.msra.mxu0 (!%p139_p2), %v1024_v1  ;;  %1005 = vmatpush1.bf16.msra.mxu1 (!%p139_p2), %v1024_v1  ;;  %v1033_v8 = vld [vmem:[%s1300_s1 + $0x30] ss:$8 sps:$4 sm:$0xff] (!%p139_p2)   ;;  %v1034_v9 = vld [vmem:[%s1300_s1 + $0x44] ss:$8 sps:$4 sm:$0xff] (!%p139_p2)   ;;  %v1036_v10 = vld [vmem:[%s1300_s1 + $0x40] ss:$8 sps:$4 sm:$0xff] (!%p139_p2)  }
   0x9   : > { %415 = vmatprep.subr.bf16.mxu0 (!%p139_p2), %v1025_v3  ;;  %998 = vmatprep.subr.bf16.mxu1 (!%p139_p2), %v1025_v3  ;;  %v1037_v11 = vld [vmem:[%s1300_s1 + $0x54] ss:$8 sps:$4 sm:$0xff] (!%p139_p2)   ;;  %v1039_v12 = vld [vmem:[%s1300_s1 + $0x50] ss:$8 sps:$4 sm:$0xff] (!%p139_p2)   ;;  %v1040_v13 = vld [vmem:[%s1300_s1 + $0x64] ss:$8 sps:$4 sm:$0xff] (!%p139_p2)  }
   0xa   : > { %v1042_v14 = vld [vmem:[%s1300_s1 + $0x60] ss:$8 sps:$4 sm:$0xff] (!%p139_p2)   ;;  %v1043_v15 = vld [vmem:[%s1300_s1 + $0x74] ss:$8 sps:$4 sm:$0xff] (!%p139_p2)   ;;  %v1045_v16 = vld [vmem:[%s1300_s1 + $0x70] ss:$8 sps:$4 sm:$0xff] (!%p139_p2)  }
   0xb   : > { %v228_v34 = vshrl.u32 (!%p139_p2), %v227_v33, 7  ;;  %v225_v36 = vld [vmem:[%s1301_s2] sm:$0x3] (!%p139_p2) }
   0xc   : > { %416 = vmatpush1.bf16.msra.mxu0 (!%p139_p2), %v1027_v4  ;;  %1006 = vmatpush1.bf16.msra.mxu1 (!%p139_p2), %v1027_v4 }
   0xd   : > { %s1304_s16 = smov (!%p164_p3, %s893_s16), 63  ;;  %417 = vmatprep.subr.bf16.mxu0 %v1028_v5  ;;  %999 = vmatprep.subr.bf16.mxu1 %v1028_v5  ;;  %v229_v35 = vsub.s32 0, %v228_v34  ;;  %v233_v37 = vsub.s32 1, %v228_v34 }
   0xe   : > { %s894_s25 = sshll.u32 %s1304_s16, 2  ;;  %s964_s28 = sshll.u32 %s1304_s16, 3 }
   0xf   : > { %s1128_s5 = scalar_lea.vmem %s1299_s0, %s894_s25  ;;  %v1190_v38 = vrot.slane %v225_v36, %v229_v35  ;;  %v1192_v39 = vrot.slane %v225_v36, %v233_v37  ;;  %s1202_s4 = scalar_lea.vmem %s1302_s3, %s964_s28 }
  0x10   : > { %418 = vmatpush1.bf16.msra.mxu0 %v1030_v6  ;;  %1007 = vmatpush1.bf16.msra.mxu1 %v1030_v6  ;;  %v1046_v17 = vld [vmem:[%s1128_s5] sm:$0xff]   ;;  %v1048_v19 = vld [vmem:[%s1128_s5 + $0x8] sm:$0xff]   ;;  %v1050_v21 = vld [vmem:[%s1128_s5 + $0x10] sm:$0xff]  }
  0x11   : > { %419 = vmatprep.subr.bf16.mxu0 %v1031_v7  ;;  %1000 = vmatprep.subr.bf16.mxu1 %v1031_v7  ;;  %v1047_v18 = vld [vmem:[%s1128_s5 + $0x40] sm:$0xff]   ;;  %v1049_v20 = vld [vmem:[%s1128_s5 + $0x48] sm:$0xff]   ;;  %v1051_v22 = vld [vmem:[%s1128_s5 + $0x50] sm:$0xff]  }
  0x12   : > { %v1052_v23 = vld [vmem:[%s1128_s5 + $0x18] sm:$0xff]   ;;  %v1054_v25 = vld [vmem:[%s1128_s5 + $0x20] sm:$0xff]   ;;  %v1056_v27 = vld [vmem:[%s1128_s5 + $0x28] sm:$0xff]  }
  0x13   : > { %v1053_v24 = vld [vmem:[%s1128_s5 + $0x58] sm:$0xff]   ;;  %v1055_v26 = vld [vmem:[%s1128_s5 + $0x60] sm:$0xff]   ;;  %v1057_v28 = vld [vmem:[%s1128_s5 + $0x68] sm:$0xff]  }
  0x14   : > { %420 = vmatpush1.bf16.msra.mxu0 %v1033_v8  ;;  %1008 = vmatpush1.bf16.msra.mxu1 %v1033_v8  ;;  %v1058_v29 = vld [vmem:[%s1128_s5 + $0x30] sm:$0xff]   ;;  %v1060_v31 = vld [vmem:[%s1128_s5 + $0x38] sm:$0xff]  }
  0x15   : > { %421 = vmatprep.subr.bf16.mxu0 %v1034_v9  ;;  %1001 = vmatprep.subr.bf16.mxu1 %v1034_v9  ;;  %v1059_v30 = vld [vmem:[%s1128_s5 + $0x70] sm:$0xff]   ;;  %v1061_v32 = vld [vmem:[%s1128_s5 + $0x78] sm:$0xff]  }
  0x18   : > { %422 = vmatpush1.bf16.msra.mxu0 %v1036_v10  ;;  %1009 = vmatpush1.bf16.msra.mxu1 %v1036_v10 }
  0x19   : > { %423 = vmatprep.subr.bf16.mxu0 %v1037_v11  ;;  %1002 = vmatprep.subr.bf16.mxu1 %v1037_v11 }
  0x1c   : > { %424 = vmatpush1.bf16.msra.mxu0 %v1039_v12  ;;  %1010 = vmatpush1.bf16.msra.mxu1 %v1039_v12 }
  0x1d   : > { %425 = vmatprep.subr.bf16.mxu0 %v1040_v13  ;;  %1003 = vmatprep.subr.bf16.mxu1 %v1040_v13 }
  0x20   : > { %426 = vmatpush1.bf16.msra.mxu0 %v1042_v14  ;;  %1011 = vmatpush1.bf16.msra.mxu1 %v1042_v14 }
  0x21   : > { %427 = vmatprep.subr.bf16.mxu0 %v1043_v15  ;;  %1004 = vmatprep.subr.bf16.mxu1 %v1043_v15 }
  0x24   : > { %428 = vmatpush1.bf16.msra.mxu0 %v1045_v16  ;;  %1012 = vmatpush1.bf16.msra.mxu1 %v1045_v16 }
  0x27   : > { %446 = vmatmul.mubr.bf16.vlgmr.msra.gmra.mrb[0].mxu0 %v1046_v17  ;;  %526 = vmatmul.mubr.bf16.vlgmr.msra.gmra.mrb[0].mxu1 %v1047_v18 }
  0x28   : > { %455 = vmatprep.mubr.bf16.mxu0 %v1070_v2  ;;  %535 = vmatprep.mubr.bf16.mxu1 %v1070_v2 }
  0x2f   : > { %456 = vmatmul.mubr.bf16.gmra.mrb[4].mxu0 %v1048_v19  ;;  %536 = vmatmul.mubr.bf16.gmra.mrb[4].mxu1 %v1049_v20 }
  0x30   : > { %465 = vmatprep.mubr.bf16.mxu0 %v1070_v2  ;;  %545 = vmatprep.mubr.bf16.mxu1 %v1070_v2 }
  0x37   : > { %466 = vmatmul.mubr.bf16.gmra.mrb[8].mxu0 %v1050_v21  ;;  %546 = vmatmul.mubr.bf16.gmra.mrb[8].mxu1 %v1051_v22 }
  0x38   : > { %475 = vmatprep.mubr.bf16.mxu0 %v1070_v2  ;;  %555 = vmatprep.mubr.bf16.mxu1 %v1070_v2 }
  0x3f   : > { %476 = vmatmul.mubr.bf16.gmra.mrb[12].mxu0 %v1052_v23  ;;  %556 = vmatmul.mubr.bf16.gmra.mrb[12].mxu1 %v1053_v24 }
  0x40   : > { %485 = vmatprep.mubr.bf16.mxu0 %v1070_v2  ;;  %565 = vmatprep.mubr.bf16.mxu1 %v1070_v2 }
  0x47   : > { %486 = vmatmul.mubr.bf16.gmra.mrb[16].mxu0 %v1054_v25  ;;  %566 = vmatmul.mubr.bf16.gmra.mrb[16].mxu1 %v1055_v26 }
  0x48   : > { %495 = vmatprep.mubr.bf16.mxu0 %v1070_v2  ;;  %575 = vmatprep.mubr.bf16.mxu1 %v1070_v2 }
  0x4f   : > { %496 = vmatmul.mubr.bf16.gmra.mrb[20].mxu0 %v1056_v27  ;;  %576 = vmatmul.mubr.bf16.gmra.mrb[20].mxu1 %v1057_v28 }
  0x50   : > { %505 = vmatprep.mubr.bf16.mxu0 %v1070_v2  ;;  %585 = vmatprep.mubr.bf16.mxu1 %v1070_v2 }
  0x57   : > { %506 = vmatmul.mubr.bf16.gmra.mrb[24].mxu0 %v1058_v29  ;;  %586 = vmatmul.mubr.bf16.gmra.mrb[24].mxu1 %v1059_v30 }
  0x58   : > { %515 = vmatprep.mubr.bf16.mxu0 %v1070_v2  ;;  %595 = vmatprep.mubr.bf16.mxu1 %v1070_v2 }
  0x5f   : > { %516 = vmatmul.mubr.bf16.gmra.mrb[28].mxu0 %v1060_v31  ;;  %596 = vmatmul.mubr.bf16.gmra.mrb[28].mxu1 %v1061_v32 }
  0xfa   : > { %v447_v40 = vpop.f32.mrb[0].mxu0  ;;  %v527_v41 = vpop.f32.mrb[0].mxu1 }
  0xfb   : > { %v448_v42 = vadd.f32 %v447_v40, %v1190_v38  ;;  %v528_v43 = vadd.f32 %v527_v41, %v1190_v38  ;;  %v449_v44 = vpop.f32.mrb[1].mxu0  ;;  %v529_v45 = vpop.f32.mrb[1].mxu1 }
  0xfc   : > { %v450_v46 = vadd.f32 %v449_v44, %v1192_v39  ;;  %v530_v47 = vadd.f32 %v529_v45, %v1192_v39  ;;  %v451_v48 = vpop.f32.mrb[2].mxu0  ;;  %v531_v49 = vpop.f32.mrb[2].mxu1 }
  0xfd   : > { %v452_v50 = vadd.f32 %v451_v48, %v1190_v38  ;;  %v532_v51 = vadd.f32 %v531_v49, %v1190_v38  ;;  %v453_v52 = vpop.f32.mrb[3].mxu0  ;;  %v533_v53 = vpop.f32.mrb[3].mxu1 }
  0xfe   : > { %v965_v54 = vpack.c.bf16 %v450_v46, %v448_v42  ;;  %v981_v55 = vpack.c.bf16 %v530_v47, %v528_v43  ;;  %v454_v56 = vadd.f32 %v453_v52, %v1192_v39  ;;  %v534_v57 = vadd.f32 %v533_v53, %v1192_v39 }
 0x100   : > { %798 = vst [vmem:[%s1202_s4] sm:$0xff] %v965_v54  ;;  %814 = vst [vmem:[%s1202_s4 + $0x80] sm:$0xff] %v981_v55  ;;  %v966_v58 = vpack.c.bf16 %v454_v56, %v452_v50  ;;  %v982_v59 = vpack.c.bf16 %v534_v57, %v532_v51 }
 0x102   : > { %799 = vst [vmem:[%s1202_s4 + $0x8] sm:$0xff] %v966_v58  ;;  %815 = vst [vmem:[%s1202_s4 + $0x88] sm:$0xff] %v982_v59  ;;  %v457_v60 = vpop.f32.mrb[4].mxu0  ;;  %v537_v61 = vpop.f32.mrb[4].mxu1 }
 0x103   : > { %v458_v62 = vadd.f32 %v457_v60, %v1190_v38  ;;  %v538_v63 = vadd.f32 %v537_v61, %v1190_v38  ;;  %v459_v0 = vpop.f32.mrb[5].mxu0  ;;  %v539_v1 = vpop.f32.mrb[5].mxu1 }
 0x104   : > { %v460_v2 = vadd.f32 %v459_v0, %v1192_v39  ;;  %v540_v3 = vadd.f32 %v539_v1, %v1192_v39  ;;  %v461_v4 = vpop.f32.mrb[6].mxu0  ;;  %v541_v5 = vpop.f32.mrb[6].mxu1 }
 0x105   : > { %v462_v6 = vadd.f32 %v461_v4, %v1190_v38  ;;  %v542_v7 = vadd.f32 %v541_v5, %v1190_v38  ;;  %v463_v8 = vpop.f32.mrb[7].mxu0  ;;  %v543_v9 = vpop.f32.mrb[7].mxu1 }
 0x106   : > { %v967_v10 = vpack.c.bf16 %v460_v2, %v458_v62  ;;  %v983_v11 = vpack.c.bf16 %v540_v3, %v538_v63  ;;  %v464_v12 = vadd.f32 %v463_v8, %v1192_v39  ;;  %v544_v13 = vadd.f32 %v543_v9, %v1192_v39 }
 0x108   : > { %800 = vst [vmem:[%s1202_s4 + $0x10] sm:$0xff] %v967_v10  ;;  %816 = vst [vmem:[%s1202_s4 + $0x90] sm:$0xff] %v983_v11  ;;  %v968_v14 = vpack.c.bf16 %v464_v12, %v462_v6  ;;  %v984_v15 = vpack.c.bf16 %v544_v13, %v542_v7 }
 0x10a   : > { %801 = vst [vmem:[%s1202_s4 + $0x18] sm:$0xff] %v968_v14  ;;  %817 = vst [vmem:[%s1202_s4 + $0x98] sm:$0xff] %v984_v15  ;;  %v467_v16 = vpop.f32.mrb[8].mxu0  ;;  %v547_v17 = vpop.f32.mrb[8].mxu1 }
 0x10b   : > { %v468_v18 = vadd.f32 %v467_v16, %v1190_v38  ;;  %v548_v19 = vadd.f32 %v547_v17, %v1190_v38  ;;  %v469_v20 = vpop.f32.mrb[9].mxu0  ;;  %v549_v21 = vpop.f32.mrb[9].mxu1 }
 0x10c   : > { %v470_v22 = vadd.f32 %v469_v20, %v1192_v39  ;;  %v550_v23 = vadd.f32 %v549_v21, %v1192_v39  ;;  %v471_v24 = vpop.f32.mrb[10].mxu0  ;;  %v551_v25 = vpop.f32.mrb[10].mxu1 }
 0x10d   : > { %v472_v26 = vadd.f32 %v471_v24, %v1190_v38  ;;  %v552_v27 = vadd.f32 %v551_v25, %v1190_v38  ;;  %v473_v28 = vpop.f32.mrb[11].mxu0  ;;  %v553_v29 = vpop.f32.mrb[11].mxu1 }
 0x10e   : > { %v969_v30 = vpack.c.bf16 %v470_v22, %v468_v18  ;;  %v985_v31 = vpack.c.bf16 %v550_v23, %v548_v19  ;;  %v474_v32 = vadd.f32 %v473_v28, %v1192_v39  ;;  %v554_v33 = vadd.f32 %v553_v29, %v1192_v39 }
 0x110   : > { %802 = vst [vmem:[%s1202_s4 + $0x20] sm:$0xff] %v969_v30  ;;  %818 = vst [vmem:[%s1202_s4 + $0xa0] sm:$0xff] %v985_v31  ;;  %v970_v34 = vpack.c.bf16 %v474_v32, %v472_v26  ;;  %v986_v35 = vpack.c.bf16 %v554_v33, %v552_v27 }
 0x112   : > { %803 = vst [vmem:[%s1202_s4 + $0x28] sm:$0xff] %v970_v34  ;;  %819 = vst [vmem:[%s1202_s4 + $0xa8] sm:$0xff] %v986_v35  ;;  %v477_v36 = vpop.f32.mrb[12].mxu0  ;;  %v557_v37 = vpop.f32.mrb[12].mxu1 }
 0x113   : > { %v478_v40 = vadd.f32 %v477_v36, %v1190_v38  ;;  %v558_v41 = vadd.f32 %v557_v37, %v1190_v38  ;;  %v479_v42 = vpop.f32.mrb[13].mxu0  ;;  %v559_v43 = vpop.f32.mrb[13].mxu1 }
 0x114   : > { %v480_v44 = vadd.f32 %v479_v42, %v1192_v39  ;;  %v560_v45 = vadd.f32 %v559_v43, %v1192_v39  ;;  %v481_v46 = vpop.f32.mrb[14].mxu0  ;;  %v561_v47 = vpop.f32.mrb[14].mxu1 }
 0x115   : > { %v482_v48 = vadd.f32 %v481_v46, %v1190_v38  ;;  %v562_v49 = vadd.f32 %v561_v47, %v1190_v38  ;;  %v483_v50 = vpop.f32.mrb[15].mxu0  ;;  %v563_v51 = vpop.f32.mrb[15].mxu1 }
 0x116   : > { %v971_v52 = vpack.c.bf16 %v480_v44, %v478_v40  ;;  %v987_v53 = vpack.c.bf16 %v560_v45, %v558_v41  ;;  %v484_v54 = vadd.f32 %v483_v50, %v1192_v39  ;;  %v564_v55 = vadd.f32 %v563_v51, %v1192_v39 }
 0x118   : > { %804 = vst [vmem:[%s1202_s4 + $0x30] sm:$0xff] %v971_v52  ;;  %820 = vst [vmem:[%s1202_s4 + $0xb0] sm:$0xff] %v987_v53  ;;  %v972_v56 = vpack.c.bf16 %v484_v54, %v482_v48  ;;  %v988_v57 = vpack.c.bf16 %v564_v55, %v562_v49 }
 0x11a   : > { %805 = vst [vmem:[%s1202_s4 + $0x38] sm:$0xff] %v972_v56  ;;  %821 = vst [vmem:[%s1202_s4 + $0xb8] sm:$0xff] %v988_v57  ;;  %v487_v58 = vpop.f32.mrb[16].mxu0  ;;  %v567_v59 = vpop.f32.mrb[16].mxu1 }
 0x11b   : > { %v488_v60 = vadd.f32 %v487_v58, %v1190_v38  ;;  %v568_v61 = vadd.f32 %v567_v59, %v1190_v38  ;;  %v489_v62 = vpop.f32.mrb[17].mxu0  ;;  %v569_v63 = vpop.f32.mrb[17].mxu1 }
 0x11c   : > { %v490_v0 = vadd.f32 %v489_v62, %v1192_v39  ;;  %v570_v1 = vadd.f32 %v569_v63, %v1192_v39  ;;  %v491_v2 = vpop.f32.mrb[18].mxu0  ;;  %v571_v3 = vpop.f32.mrb[18].mxu1 }
 0x11d   : > { %v492_v4 = vadd.f32 %v491_v2, %v1190_v38  ;;  %v572_v5 = vadd.f32 %v571_v3, %v1190_v38  ;;  %v493_v6 = vpop.f32.mrb[19].mxu0  ;;  %v573_v7 = vpop.f32.mrb[19].mxu1 }
 0x11e   : > { %v973_v8 = vpack.c.bf16 %v490_v0, %v488_v60  ;;  %v989_v9 = vpack.c.bf16 %v570_v1, %v568_v61  ;;  %v494_v10 = vadd.f32 %v493_v6, %v1192_v39  ;;  %v574_v11 = vadd.f32 %v573_v7, %v1192_v39 }
 0x120   : > { %806 = vst [vmem:[%s1202_s4 + $0x40] sm:$0xff] %v973_v8  ;;  %822 = vst [vmem:[%s1202_s4 + $0xc0] sm:$0xff] %v989_v9  ;;  %v974_v12 = vpack.c.bf16 %v494_v10, %v492_v4  ;;  %v990_v13 = vpack.c.bf16 %v574_v11, %v572_v5 }
 0x122   : > { %807 = vst [vmem:[%s1202_s4 + $0x48] sm:$0xff] %v974_v12  ;;  %823 = vst [vmem:[%s1202_s4 + $0xc8] sm:$0xff] %v990_v13  ;;  %v497_v14 = vpop.f32.mrb[20].mxu0  ;;  %v577_v15 = vpop.f32.mrb[20].mxu1 }
 0x123   : > { %v498_v16 = vadd.f32 %v497_v14, %v1190_v38  ;;  %v578_v17 = vadd.f32 %v577_v15, %v1190_v38  ;;  %v499_v18 = vpop.f32.mrb[21].mxu0  ;;  %v579_v19 = vpop.f32.mrb[21].mxu1 }
 0x124   : > { %v500_v20 = vadd.f32 %v499_v18, %v1192_v39  ;;  %v580_v21 = vadd.f32 %v579_v19, %v1192_v39  ;;  %v501_v22 = vpop.f32.mrb[22].mxu0  ;;  %v581_v23 = vpop.f32.mrb[22].mxu1 }
 0x125   : > { %v502_v24 = vadd.f32 %v501_v22, %v1190_v38  ;;  %v582_v25 = vadd.f32 %v581_v23, %v1190_v38  ;;  %v503_v26 = vpop.f32.mrb[23].mxu0  ;;  %v583_v27 = vpop.f32.mrb[23].mxu1 }
 0x126   : > { %v975_v28 = vpack.c.bf16 %v500_v20, %v498_v16  ;;  %v991_v29 = vpack.c.bf16 %v580_v21, %v578_v17  ;;  %v504_v30 = vadd.f32 %v503_v26, %v1192_v39  ;;  %v584_v31 = vadd.f32 %v583_v27, %v1192_v39 }
 0x128   : > { %808 = vst [vmem:[%s1202_s4 + $0x50] sm:$0xff] %v975_v28  ;;  %824 = vst [vmem:[%s1202_s4 + $0xd0] sm:$0xff] %v991_v29  ;;  %v976_v32 = vpack.c.bf16 %v504_v30, %v502_v24  ;;  %v992_v33 = vpack.c.bf16 %v584_v31, %v582_v25 }
 0x12a   : > { %809 = vst [vmem:[%s1202_s4 + $0x58] sm:$0xff] %v976_v32  ;;  %825 = vst [vmem:[%s1202_s4 + $0xd8] sm:$0xff] %v992_v33  ;;  %v507_v34 = vpop.f32.mrb[24].mxu0  ;;  %v587_v35 = vpop.f32.mrb[24].mxu1 }
 0x12b   : > { %v508_v36 = vadd.f32 %v507_v34, %v1190_v38  ;;  %v588_v37 = vadd.f32 %v587_v35, %v1190_v38  ;;  %v509_v40 = vpop.f32.mrb[25].mxu0  ;;  %v589_v41 = vpop.f32.mrb[25].mxu1 }
 0x12c   : > { %v510_v42 = vadd.f32 %v509_v40, %v1192_v39  ;;  %v590_v43 = vadd.f32 %v589_v41, %v1192_v39  ;;  %v511_v44 = vpop.f32.mrb[26].mxu0  ;;  %v591_v45 = vpop.f32.mrb[26].mxu1 }
 0x12d   : > { %v512_v46 = vadd.f32 %v511_v44, %v1190_v38  ;;  %v592_v47 = vadd.f32 %v591_v45, %v1190_v38  ;;  %v513_v48 = vpop.f32.mrb[27].mxu0  ;;  %v593_v49 = vpop.f32.mrb[27].mxu1 }
 0x12e   : > { %v977_v50 = vpack.c.bf16 %v510_v42, %v508_v36  ;;  %v993_v51 = vpack.c.bf16 %v590_v43, %v588_v37  ;;  %v514_v52 = vadd.f32 %v513_v48, %v1192_v39  ;;  %v594_v53 = vadd.f32 %v593_v49, %v1192_v39 }
 0x130   : > { %810 = vst [vmem:[%s1202_s4 + $0x60] sm:$0xff] %v977_v50  ;;  %826 = vst [vmem:[%s1202_s4 + $0xe0] sm:$0xff] %v993_v51  ;;  %v978_v54 = vpack.c.bf16 %v514_v52, %v512_v46  ;;  %v994_v55 = vpack.c.bf16 %v594_v53, %v592_v47 }
 0x132   : > { %811 = vst [vmem:[%s1202_s4 + $0x68] sm:$0xff] %v978_v54  ;;  %827 = vst [vmem:[%s1202_s4 + $0xe8] sm:$0xff] %v994_v55  ;;  %v517_v56 = vpop.f32.mrb[28].mxu0  ;;  %v597_v57 = vpop.f32.mrb[28].mxu1 }
 0x133   : > { %v518_v58 = vadd.f32 %v517_v56, %v1190_v38  ;;  %v598_v59 = vadd.f32 %v597_v57, %v1190_v38  ;;  %v519_v60 = vpop.f32.mrb[29].mxu0  ;;  %v599_v61 = vpop.f32.mrb[29].mxu1 }
 0x134   : > { %v520_v62 = vadd.f32 %v519_v60, %v1192_v39  ;;  %v600_v63 = vadd.f32 %v599_v61, %v1192_v39  ;;  %v521_v0 = vpop.f32.mrb[30].mxu0  ;;  %v601_v1 = vpop.f32.mrb[30].mxu1 }
 0x135   : > { %v522_v2 = vadd.f32 %v521_v0, %v1190_v38  ;;  %v602_v3 = vadd.f32 %v601_v1, %v1190_v38  ;;  %v523_v4 = vpop.f32.mrb[31].mxu0  ;;  %v603_v5 = vpop.f32.mrb[31].mxu1 }
 0x136   : > { %v979_v6 = vpack.c.bf16 %v520_v62, %v518_v58  ;;  %v995_v7 = vpack.c.bf16 %v600_v63, %v598_v59  ;;  %v524_v8 = vadd.f32 %v523_v4, %v1192_v39  ;;  %v604_v9 = vadd.f32 %v603_v5, %v1192_v39 }
 0x138   : > { %812 = vst [vmem:[%s1202_s4 + $0x70] sm:$0xff] %v979_v6  ;;  %828 = vst [vmem:[%s1202_s4 + $0xf0] sm:$0xff] %v995_v7  ;;  %v980_v10 = vpack.c.bf16 %v524_v8, %v522_v2  ;;  %v996_v11 = vpack.c.bf16 %v604_v9, %v602_v3 }
 0x13a   : > { %813 = vst [vmem:[%s1202_s4 + $0x78] sm:$0xff] %v980_v10  ;;  %829 = vst [vmem:[%s1202_s4 + $0xf8] sm:$0xff] %v996_v11 }
 0x13b PF: > { %s13_s12 = sadd.s32 1, %s1068_s12  }
 0x13c   : > { %p10_p4 = scmp.ge.s32.totalorder %s13_s12, 4  }
 0x13e   :  { %12 = sbr.rel (!%p10_p4) target bundleno = 1 (0x1), region = 62 }

// kernel: nonlocal_block_forward.3
= control target key start
LH: loop header
LB: loop body
LE: loop exit
PB: predicated region body
PF: predicated region fallthrough
CT: control target
= control target key end

     0   :  { %11 = vsyncpa [#allocation3], 0  ;;  %s2921_s0 = inlined_call_operand.vmem [shape: bf16[2,256,64], index: 0, kind: input, shape index: {}]   ;;  %s2922_s1 = inlined_call_operand.vmem [shape: bf16[2,32,64], index: 1, kind: input, shape index: {}]   ;;  %s2923_s2 = inlined_call_operand.vmem [shape: bf16[2,32,64], index: 2, kind: input, shape index: {}]   ;;  %s2924_s3 = inlined_call_operand.vmem [shape: f32[2,256,128], index: 3, kind: input, shape index: {}]   ;;  %s2925_s4 = inlined_call_operand.vmem [shape: bf16[64,128], index: 4, kind: input, shape index: {}]   ;;  %s2926_s5 = inlined_call_operand.vmem [shape: f32[1,128], index: 5, kind: input, shape index: {}]   ;;  %s2927_s6 = inlined_call_operand.hbm [shape: f32[2,256,128], index: 6, kind: output, shape index: {}]  }
   0x1   :  { %13 = vsyncpa [#allocation3 + $0x1], 0  ;;  %s2284_s21 = smov 0   ;;  %s2286_s22 = smov 0  }
   0x2   :  { %s2288_s23 = smov 0   ;;  %s2290_s24 = smov 0  }
   0x3 LB: > { %s2305_s25 = sadd.s32 4294967295, %s2244_s24   ;;  %s1719_s26 = sadd.s32 4294967294, %s2244_s24   ;;  %s2244_s24 = sphi %s2290_s24, %s2933_s24   ;;  %s2240_s23 = sphi %s2288_s23, %s2932_s23   ;;  %s2236_s22 = sphi %s2286_s22, %s2931_s22   ;;  %s2232_s21 = sphi %s2284_s21, %s2930_s21  }
   0x4   : > { %s2309_s27 = sadd.s32 1, %s2244_s24   ;;  %s172_s28 = sadd.s32 1, %s2240_s23 }
   0x5   : > { %s169_s29 = ssub.s32 %s2244_s24, %s2309_s27  ;;  %p182_p0 = scmp.ne.s32.totalorder %s2240_s23, %s2236_s22 }
   0x6   : > { %p170_p1 = scmp.eq.s32.totalorder %s169_s29, 0  ;;  %p183_p2 = scmp.eq.s32.totalorder %s2305_s25, 1 }
   0x7   : > { %p188_p3 = scmp.ne.s32.totalorder %s2236_s22, %s2232_s21  ;;  %p189_p4 = scmp.eq.s32.totalorder %s1719_s26, 1 }
   0x8   : > { %s2320_s30 = scalar_select %p170_p1, %s2240_s23, %s172_s28  }
   0x9   : > { %p2322_p5 = por %p183_p2, %p182_p0  ;;  %p2326_p6 = por %p189_p4, %p188_p3 }
   0xa   : > { %p1722_p7 = scmp.ge.s32.totalorder %s2244_s24, 1  ;;  %p245_p8 = scmp.lt.s32.totalorder %s2244_s24, 3 }
   0xc   : > { %p246_p9 = pnand %p1722_p7, %p245_p8 }
   0xd   : > { %p290_p10 = scmp.lt.s32.totalorder (!%p246_p9), %s2305_s25, 1  ;;  %vm441_vm0 = vcmask (!%p246_p9), 523264   ;;  %vm657_vm1 = vcmask (!%p246_p9), 261120   ;;  %s287_s16 = sand.u32 (!%p246_p9), 1, %s2236_s22  }
   0xe   : > { %249 = sbr.rel (%p246_p9) target bundleno = 1087 (0x43f), region = 44  ;;  %s1723_s28 = sshll.u32 (!%p246_p9), %s287_s16, 8 }
   0xf   : > { %s1814_s29 = sshll.u32 (!%p246_p9), %s2305_s25, 12 }
  0x10   : > { %s2871_s13 = scalar_lea.hbm (!%p246_p9), %s2927_s6, %s1814_s29 }
  0x15   : > { %s2334_s9 = scalar_select %p290_p10, %s2305_s25, 1 }
  0x16   : > { %s2880_s25 = scalar_lea.sflag [#allocation3], %s287_s16 }
  0x17   : > { %s1810_s10 = sshll.u32 %s2334_s9, 7  ;;  %s1811_s11 = sshll.u32 %s2334_s9, 4 }
  0x18   : > { %s2341_s14 = scalar_lea.vmem %s2921_s0, %s1810_s10  ;;  %s299_s17 = scalar_lea.vmem %s2922_s1, %s1811_s11 }
  0x19   : > { %v2030_v0 = vld [vmem:[%s299_s17] sm:$0xff]   ;;  %v2031_v1 = vld [vmem:[%s299_s17 + $0x8] sm:$0xff]   ;;  %v2034_v6 = vld [vmem:[%s2341_s14 + $0x10] sm:$0xff]   ;;  %s2357_s20 = scalar_lea.vmem %s2923_s2, %s1811_s11  ;;  %s1813_s15 = sshll.u32 %s2334_s9, 8 }
  0x1a   : > { %1987 = vmatprep.subr.msk.bf16.mxu0 %vm441_vm0, %v2030_v0  ;;  %v491_v2 = vsel %vm441_vm0, %v2030_v0, 0  ;;  %v2032_v3 = vld [vmem:[%s2341_s14] sm:$0xff]   ;;  %v494_v4 = vsel %vm441_vm0, %v2031_v1, 0  ;;  %v2033_v5 = vld [vmem:[%s2341_s14 + $0x8] sm:$0xff]   ;;  %v2035_v7 = vld [vmem:[%s2341_s14 + $0x18] sm:$0xff]   ;;  %s2762_s19 = scalar_lea.vmem %s2924_s3, %s1813_s15  ;;  %s2779_s9 = scalar_lea.vmem [#allocation2], %s1723_s28 }
  0x1b   : > { %1872 = vmatpush3.bf16.xpose.msra.mxu0 %v491_v2  ;;  %1875 = vmatprep.mubr.msk.bf16.mxu0 %vm441_vm0, %v2032_v3  ;;  %v2036_v8 = vld [vmem:[%s2341_s14 + $0x20] sm:$0xff]   ;;  %v2037_v9 = vld [vmem:[%s2341_s14 + $0x28] sm:$0xff]   ;;  %v2038_v10 = vld [vmem:[%s2341_s14 + $0x30] sm:$0xff]   ;;  %s1621_s10 = sshll.u32 %s2779_s9, 4  ;;  %s2246_s15 = smov [#allocation2]   ;;  %s2873_s10 = int_to_ptr.vmem [resolvable:$true] %s1621_s10 }
  0x1c   : > { %1988 = vmatprep.subr.msk.bf16.mxu0 %vm441_vm0, %v2031_v1  ;;  %v2039_v11 = vld [vmem:[%s2341_s14 + $0x38] sm:$0xff]   ;;  %v2040_v12 = vld [vmem:[%s2341_s14 + $0x40] sm:$0xff]   ;;  %v2041_v13 = vld [vmem:[%s2341_s14 + $0x48] sm:$0xff]   ;;  %s2186_s17 = sshll.u32 %s2246_s15, 4  ;;  %s2187_s17 = int_to_ptr.vmem [resolvable:$false] %s2186_s17 }
  0x1d   : > { %v2042_v14 = vld [vmem:[%s2341_s14 + $0x50] sm:$0xff]   ;;  %v2043_v15 = vld [vmem:[%s2341_s14 + $0x58] sm:$0xff]   ;;  %v2044_v16 = vld [vmem:[%s2341_s14 + $0x60] sm:$0xff]   ;;  %s2188_s18 = scalar_lea.vmem %s2187_s17, 8192  ;;  %p2189_p0 = scmp.lt.s32.totalorder %s2873_s10, %s2187_s17 }
  0x1e   : > { %v2045_v17 = vld [vmem:[%s2341_s14 + $0x68] sm:$0xff]   ;;  %v2046_v18 = vld [vmem:[%s2341_s14 + $0x70] sm:$0xff]   ;;  %v2047_v19 = vld [vmem:[%s2341_s14 + $0x78] sm:$0xff]   ;;  %s2182_s14 = scalar_lea.vmem %s2873_s10, 4096 }
  0x1f   : > { %p2183_p11 = scmp.ne.s32.totalorder %s2873_s10, %s2182_s14  ;;  %p2190_p1 = scmp.lt.s32.totalorder %s2188_s18, %s2182_s14 }
  0x21   : > { %p2184_p12 = pnand %p2183_p11, %p2322_p5  ;;  %p2191_p2 = por %p2190_p1, %p2189_p0 }
  0x23   : > { %1874 = vmatpush3.bf16.xpose.msra.mxu0 %v494_v4  ;;  %p2185_p13 = pneg %p2184_p12 }
  0x25   : > { %p2192_p3 = pnand %p2191_p2, %p2185_p13 }
  0x2a   : > { %1876 = vmatmul.mubr.msk.bf16.vlgmr.msra.gmra.mrb[0].mxu0 %vm441_vm0, %v2033_v5 }
  0x2b   : > { %1879 = vmatprep.mubr.msk.bf16.mxu0 %vm441_vm0, %v2034_v6 }
  0x32   : > { %1880 = vmatmul.mubr.msk.bf16.gmra.mrb[4].mxu0 %vm441_vm0, %v2035_v7 }
  0x33   : > { %1883 = vmatprep.mubr.msk.bf16.mxu0 %vm441_vm0, %v2036_v8 }
  0x3a   : > { %1884 = vmatmul.mubr.msk.bf16.gmra.mrb[8].mxu0 %vm441_vm0, %v2037_v9 }
  0x3b   : > { %1887 = vmatprep.mubr.msk.bf16.mxu0 %vm441_vm0, %v2038_v10 }
  0x42   : > { %1888 = vmatmul.mubr.msk.bf16.gmra.mrb[12].mxu0 %vm441_vm0, %v2039_v11 }
  0x43   : > { %1891 = vmatprep.mubr.msk.bf16.mxu0 %vm441_vm0, %v2040_v12 }
  0x4a   : > { %1892 = vmatmul.mubr.msk.bf16.gmra.mrb[16].mxu0 %vm441_vm0, %v2041_v13 }
  0x4b   : > { %1895 = vmatprep.mubr.msk.bf16.mxu0 %vm441_vm0, %v2042_v14 }
  0x52   : > { %1896 = vmatmul.mubr.msk.bf16.gmra.mrb[20].mxu0 %vm441_vm0, %v2043_v15 }
  0x53   : > { %1899 = vmatprep.mubr.msk.bf16.mxu0 %vm441_vm0, %v2044_v16 }
  0x5a   : > { %1900 = vmatmul.mubr.msk.bf16.gmra.mrb[24].mxu0 %vm441_vm0, %v2045_v17 }
  0x5b   : > { %1903 = vmatprep.mubr.msk.bf16.mxu0 %vm441_vm0, %v2046_v18 }
  0x62   : > { %1904 = vmatmul.mubr.msk.bf16.gmra.mrb[28].mxu0 %vm441_vm0, %v2047_v19 }
  0xfd   : > { %v2387_v20 = vpop.f32.mrb[0].mxu0 }
  0xfe   : > { %v2389_v21 = vpop.f32.mrb[1].mxu0  ;;  %v664_v22 = vsel %vm657_vm1, %v2387_v20, -inf }
  0xff   : > { %665 = vmax.xlane.f32.xlu1 %v664_v22  ;;  %v2393_v23 = vpop.f32.mrb[2].mxu0  ;;  %v658_v24 = vsel %vm657_vm1, %v2389_v21, -inf  ;;  %v2048_v22 = vld [vmem:[%s2357_s20] sm:$0xff]  }
 0x100   : > { %659 = vmax.xlane.f32.xlu0 %v658_v24  ;;  %v2397_v25 = vpop.f32.mrb[3].mxu0  ;;  %v667_v26 = vsel %vm657_vm1, %v2393_v23, -inf  ;;  %v2049_v24 = vld [vmem:[%s2357_s20 + $0x8] sm:$0xff]   ;;  %1907 = vmatprep.subr.bf16.mxu0 %v2048_v22 }
 0x101   : > { %v661_v27 = vsel %vm657_vm1, %v2397_v25, -inf  ;;  %1983 = vmatprep.subr.bf16.mxu1 %v2048_v22  ;;  %1908 = vmatpush3.bf16.msra.mxu0 %v2048_v22 }
 0x102   : > { %1985 = vmatpush3.bf16.msra.mxu1 %v2048_v22  ;;  %1909 = vmatprep.subr.bf16.mxu0 %v2049_v24 }
 0x103   : > { %668 = vmax.xlane.f32.xlu1 %v667_v26  ;;  %1984 = vmatprep.subr.bf16.mxu1 %v2049_v24 }
 0x104   : > { %662 = vmax.xlane.f32.xlu0 %v661_v27 }
 0x105   : > { %v2403_v28 = vpop.f32.mrb[4].mxu0  ;;  %1910 = vmatpush3.bf16.msra.mxu0 %v2049_v24 }
 0x106   : > { %v2405_v29 = vpop.f32.mrb[5].mxu0  ;;  %v676_v34 = vsel %vm657_vm1, %v2403_v28, -inf  ;;  %1986 = vmatpush3.bf16.msra.mxu1 %v2049_v24 }
 0x107   : > { %v2407_v30 = vpop.f32.mrb[6].mxu0  ;;  %v670_v31 = vsel %vm657_vm1, %v2405_v29, -inf }
 0x108   : > { %671 = vmax.xlane.f32.xlu0 %v670_v31  ;;  %v2411_v32 = vpop.f32.mrb[7].mxu0  ;;  %v679_v36 = vsel %vm657_vm1, %v2407_v30, -inf }
 0x109   : > { %v673_v33 = vsel %vm657_vm1, %v2411_v32, -inf }
 0x10a   : > { %674 = vmax.xlane.f32.xlu1 %v673_v33 }
 0x10c   : > { %677 = vmax.xlane.f32.xlu0 %v676_v34 }
 0x10d   : > { %v2417_v35 = vpop.f32.mrb[8].mxu0 }
 0x10e   : > { %680 = vmax.xlane.f32.xlu1 %v679_v36  ;;  %v2421_v37 = vpop.f32.mrb[9].mxu0  ;;  %v688_v42 = vsel %vm657_vm1, %v2417_v35, -inf }
 0x10f   : > { %v2423_v38 = vpop.f32.mrb[10].mxu0  ;;  %v682_v39 = vsel %vm657_vm1, %v2421_v37, -inf }
 0x110   : > { %683 = vmax.xlane.f32.xlu0 %v682_v39  ;;  %v2427_v40 = vpop.f32.mrb[11].mxu0  ;;  %v691_v44 = vsel %vm657_vm1, %v2423_v38, -inf }
 0x111   : > { %v685_v41 = vsel %vm657_vm1, %v2427_v40, -inf }
 0x112   : > { %686 = vmax.xlane.f32.xlu1 %v685_v41 }
 0x114   : > { %689 = vmax.xlane.f32.xlu0 %v688_v42 }
 0x115   : > { %v2433_v43 = vpop.f32.mrb[12].mxu0 }
 0x116   : > { %692 = vmax.xlane.f32.xlu1 %v691_v44  ;;  %v2437_v45 = vpop.f32.mrb[13].mxu0  ;;  %v700_v50 = vsel %vm657_vm1, %v2433_v43, -inf }
 0x117   : > { %v2439_v46 = vpop.f32.mrb[14].mxu0  ;;  %v694_v47 = vsel %vm657_vm1, %v2437_v45, -inf }
 0x118   : > { %695 = vmax.xlane.f32.xlu0 %v694_v47  ;;  %v2443_v48 = vpop.f32.mrb[15].mxu0  ;;  %v703_v52 = vsel %vm657_vm1, %v2439_v46, -inf }
 0x119   : > { %v697_v49 = vsel %vm657_vm1, %v2443_v48, -inf }
 0x11a   : > { %698 = vmax.xlane.f32.xlu1 %v697_v49 }
 0x11c   : > { %701 = vmax.xlane.f32.xlu0 %v700_v50 }
 0x11d   : > { %v2449_v51 = vpop.f32.mrb[16].mxu0 }
 0x11e   : > { %704 = vmax.xlane.f32.xlu1 %v703_v52  ;;  %v2453_v53 = vpop.f32.mrb[17].mxu0  ;;  %v712_v58 = vsel %vm657_vm1, %v2449_v51, -inf }
 0x11f   : > { %v2455_v54 = vpop.f32.mrb[18].mxu0  ;;  %v706_v55 = vsel %vm657_vm1, %v2453_v53, -inf }
 0x120   : > { %707 = vmax.xlane.f32.xlu0 %v706_v55  ;;  %v2459_v56 = vpop.f32.mrb[19].mxu0  ;;  %v715_v60 = vsel %vm657_vm1, %v2455_v54, -inf }
 0x121   : > { %v709_v57 = vsel %vm657_vm1, %v2459_v56, -inf }
 0x122   : > { %710 = vmax.xlane.f32.xlu1 %v709_v57 }
 0x124   : > { %713 = vmax.xlane.f32.xlu0 %v712_v58 }
 0x125   : > { %v2465_v59 = vpop.f32.mrb[20].mxu0 }
 0x126   : > { %716 = vmax.xlane.f32.xlu1 %v715_v60  ;;  %v2469_v61 = vpop.f32.mrb[21].mxu0  ;;  %v724_v2 = vsel %vm657_vm1, %v2465_v59, -inf }
 0x127   : > { %v2471_v62 = vpop.f32.mrb[22].mxu0  ;;  %v718_v63 = vsel %vm657_vm1, %v2469_v61, -inf }
 0x128   : > { %719 = vmax.xlane.f32.xlu0 %v718_v63  ;;  %v2475_v0 = vpop.f32.mrb[23].mxu0  ;;  %v727_v4 = vsel %vm657_vm1, %v2471_v62, -inf }
 0x129   : > { %v721_v1 = vsel %vm657_vm1, %v2475_v0, -inf }
 0x12a   : > { %722 = vmax.xlane.f32.xlu1 %v721_v1 }
 0x12c   : > { %725 = vmax.xlane.f32.xlu0 %v724_v2 }
 0x12d   : > { %v2481_v3 = vpop.f32.mrb[24].mxu0 }
 0x12e   : > { %728 = vmax.xlane.f32.xlu1 %v727_v4  ;;  %v2485_v5 = vpop.f32.mrb[25].mxu0  ;;  %v736_v10 = vsel %vm657_vm1, %v2481_v3, -inf }
 0x12f   : > { %v2487_v6 = vpop.f32.mrb[26].mxu0  ;;  %v730_v7 = vsel %vm657_vm1, %v2485_v5, -inf }
 0x130   : > { %731 = vmax.xlane.f32.xlu0 %v730_v7  ;;  %v2491_v8 = vpop.f32.mrb[27].mxu0  ;;  %v739_v12 = vsel %vm657_vm1, %v2487_v6, -inf }
 0x131   : > { %v733_v9 = vsel %vm657_vm1, %v2491_v8, -inf }
 0x132   : > { %734 = vmax.xlane.f32.xlu1 %v733_v9 }
 0x134   : > { %737 = vmax.xlane.f32.xlu0 %v736_v10 }
 0x135   : > { %v2497_v11 = vpop.f32.mrb[28].mxu0 }
 0x136   : > { %740 = vmax.xlane.f32.xlu1 %v739_v12  ;;  %v2501_v13 = vpop.f32.mrb[29].mxu0  ;;  %v748_v18 = vsel %vm657_vm1, %v2497_v11, -inf }
 0x137   : > { %v2503_v14 = vpop.f32.mrb[30].mxu0  ;;  %v742_v15 = vsel %vm657_vm1, %v2501_v13, -inf }
 0x138   : > { %743 = vmax.xlane.f32.xlu0 %v742_v15  ;;  %v2507_v16 = vpop.f32.mrb[31].mxu0  ;;  %v751_v19 = vsel %vm657_vm1, %v2503_v14, -inf }
 0x139   : > { %v745_v17 = vsel %vm657_vm1, %v2507_v16, -inf }
 0x13a   : > { %746 = vmax.xlane.f32.xlu1 %v745_v17 }
 0x13c   : > { %749 = vmax.xlane.f32.xlu0 %v748_v18 }
 0x13e   : > { %752 = vmax.xlane.f32.xlu1 %v751_v19 }
 0x18c   : > { %v666_v26 = vpop.xlane.xlu1 %665 }
 0x18d   : > { %v756_v27 = vsub.f32 %v2387_v20, %v666_v26  ;;  %v660_v31 = vpop.xlane.xlu0 %659 }
 0x18e   : > { %v754_v33 = vsub.f32 %v2389_v21, %v660_v31 }
 0x18f   : > { %v790_v34 = vmul.f32 1.442695, %v756_v27 }
 0x190   : > { %v786_v36 = vmul.f32 1.442695, %v754_v33  ;;  %v669_v39 = vpop.xlane.xlu1 %668 }
 0x191   : > { %v757_v41 = vsub.f32 %v2393_v23, %v669_v39  ;;  %v663_v42 = vpop.xlane.xlu0 %662 }
 0x192   : > { %2054 = vpow2.f32 %v786_v36  ;;  %v755_v44 = vsub.f32 %v2397_v25, %v663_v42 }
 0x193   : > { %2056 = vpow2.f32 %v790_v34  ;;  %v792_v47 = vmul.f32 1.442695, %v757_v41 }
 0x194   : > { %v788_v49 = vmul.f32 1.442695, %v755_v44 }
 0x195   : > { %v672_v50 = vpop.xlane.xlu0 %671 }
 0x196   : > { %2058 = vpow2.f32 %v788_v49  ;;  %v758_v52 = vsub.f32 %v2405_v29, %v672_v50 }
 0x197   : > { %v675_v20 = vpop.xlane.xlu1 %674  ;;  %2060 = vpow2.f32 %v792_v47 }
 0x198   : > { %v794_v55 = vmul.f32 1.442695, %v758_v52  ;;  %v759_v21 = vsub.f32 %v2411_v32, %v675_v20 }
 0x199   : > { %v678_v57 = vpop.xlane.xlu0 %677 }
 0x19a   : > { %2062 = vpow2.f32 %v794_v55  ;;  %v796_v58 = vmul.f32 1.442695, %v759_v21  ;;  %v760_v23 = vsub.f32 %v2403_v28, %v678_v57 }
 0x19b   : > { %v681_v60 = vpop.xlane.xlu1 %680 }
 0x19c   : > { %v2524_v63 = vpop.eup %2054  ;;  %2064 = vpow2.f32 %v796_v58  ;;  %v798_v25 = vmul.f32 1.442695, %v760_v23  ;;  %v761_v1 = vsub.f32 %v2407_v30, %v681_v60 }
 0x19d   : > { %v684_v2 = vpop.xlane.xlu0 %683  ;;  %v850_v29 = vsel %vm657_vm1, %v2524_v63, 0.0  ;;  %v2529_v4 = vpop.eup %2056 }
 0x19e   : > { %2066 = vpow2.f32 %v798_v25  ;;  %v800_v32 = vmul.f32 1.442695, %v761_v1  ;;  %v762_v7 = vsub.f32 %v2421_v37, %v684_v2  ;;  %851 = vadd.xlane.f32.xlu0 %v850_v29  ;;  %v856_v30 = vsel %vm657_vm1, %v2529_v4, 0.0 }
 0x19f   : > { %v687_v9 = vpop.xlane.xlu1 %686 }
 0x1a0   : > { %v2532_v28 = vpop.eup %2058  ;;  %2068 = vpow2.f32 %v800_v32  ;;  %v802_v10 = vmul.f32 1.442695, %v762_v7  ;;  %v763_v12 = vsub.f32 %v2427_v40, %v687_v9 }
 0x1a1   : > { %v690_v15 = vpop.xlane.xlu0 %689  ;;  %v853_v17 = vsel %vm657_vm1, %v2532_v28, 0.0  ;;  %v2539_v18 = vpop.eup %2060 }
 0x1a2   : > { %2070 = vpow2.f32 %v802_v10  ;;  %v804_v19 = vmul.f32 1.442695, %v763_v12  ;;  %v764_v37 = vsub.f32 %v2417_v35, %v690_v15  ;;  %857 = vadd.xlane.f32.xlu0 %v856_v30  ;;  %854 = vadd.xlane.f32.xlu1 %v853_v17  ;;  %v859_v33 = vsel %vm657_vm1, %v2539_v18, 0.0 }
 0x1a3   : > { %v693_v22 = vpop.xlane.xlu1 %692 }
 0x1a4   : > { %v2542_v24 = vpop.eup %2062  ;;  %2072 = vpow2.f32 %v804_v19  ;;  %v806_v40 = vmul.f32 1.442695, %v764_v37  ;;  %v765_v26 = vsub.f32 %v2423_v38, %v693_v22 }
 0x1a5   : > { %v696_v27 = vpop.xlane.xlu0 %695  ;;  %v862_v31 = vsel %vm657_vm1, %v2542_v24, 0.0 }
 0x1a6   : > { %v2549_v34 = vpop.eup %2064  ;;  %2074 = vpow2.f32 %v806_v40  ;;  %v808_v35 = vmul.f32 1.442695, %v765_v26  ;;  %v766_v36 = vsub.f32 %v2437_v45, %v696_v27  ;;  %863 = vadd.xlane.f32.xlu0 %v862_v31  ;;  %860 = vadd.xlane.f32.xlu1 %v859_v33 }
 0x1a7   : > { %v699_v39 = vpop.xlane.xlu1 %698  ;;  %v865_v49 = vsel %vm657_vm1, %v2549_v34, 0.0 }
 0x1a8   : > { %v2552_v41 = vpop.eup %2066  ;;  %2076 = vpow2.f32 %v808_v35  ;;  %v810_v38 = vmul.f32 1.442695, %v766_v36  ;;  %v767_v42 = vsub.f32 %v2443_v48, %v699_v39 }
 0x1a9   : > { %v702_v44 = vpop.xlane.xlu0 %701  ;;  %v868_v47 = vsel %vm657_vm1, %v2552_v41, 0.0 }
 0x1aa   : > { %v2559_v50 = vpop.eup %2068  ;;  %2078 = vpow2.f32 %v810_v38  ;;  %v812_v45 = vmul.f32 1.442695, %v767_v42  ;;  %v768_v52 = vsub.f32 %v2433_v43, %v702_v44  ;;  %869 = vadd.xlane.f32.xlu0 %v868_v47  ;;  %866 = vadd.xlane.f32.xlu1 %v865_v49 }
 0x1ab   : > { %v705_v20 = vpop.xlane.xlu1 %704  ;;  %v871_v23 = vsel %vm657_vm1, %v2559_v50, 0.0 }
 0x1ac   : > { %v2562_v55 = vpop.eup %2070  ;;  %2080 = vpow2.f32 %v812_v45  ;;  %v814_v48 = vmul.f32 1.442695, %v768_v52  ;;  %v769_v21 = vsub.f32 %v2439_v46, %v705_v20 }
 0x1ad   : > { %v708_v57 = vpop.xlane.xlu0 %707  ;;  %v874_v58 = vsel %vm657_vm1, %v2562_v55, 0.0 }
 0x1ae   : > { %v2569_v60 = vpop.eup %2072  ;;  %2082 = vpow2.f32 %v814_v48  ;;  %v816_v43 = vmul.f32 1.442695, %v769_v21  ;;  %v770_v25 = vsub.f32 %v2453_v53, %v708_v57  ;;  %875 = vadd.xlane.f32.xlu0 %v874_v58  ;;  %872 = vadd.xlane.f32.xlu1 %v871_v23 }
 0x1af   : > { %v711_v1 = vpop.xlane.xlu1 %710  ;;  %v877_v9 = vsel %vm657_vm1, %v2569_v60, 0.0 }
 0x1b0   : > { %v2572_v2 = vpop.eup %2074  ;;  %2084 = vpow2.f32 %v816_v43  ;;  %v818_v46 = vmul.f32 1.442695, %v770_v25  ;;  %v771_v29 = vsub.f32 %v2459_v56, %v711_v1 }
 0x1b1   : > { %v714_v32 = vpop.xlane.xlu0 %713  ;;  %v880_v7 = vsel %vm657_vm1, %v2572_v2, 0.0 }
 0x1b2   : > { %v2579_v10 = vpop.eup %2076  ;;  %2086 = vpow2.f32 %v818_v46  ;;  %v820_v53 = vmul.f32 1.442695, %v771_v29  ;;  %v772_v12 = vsub.f32 %v2449_v51, %v714_v32  ;;  %881 = vadd.xlane.f32.xlu0 %v880_v7  ;;  %878 = vadd.xlane.f32.xlu1 %v877_v9 }
 0x1b3   : > { %v717_v15 = vpop.xlane.xlu1 %716  ;;  %v883_v22 = vsel %vm657_vm1, %v2579_v10, 0.0 }
 0x1b4   : > { %v2582_v30 = vpop.eup %2078  ;;  %2088 = vpow2.f32 %v820_v53  ;;  %v822_v56 = vmul.f32 1.442695, %v772_v12  ;;  %v773_v17 = vsub.f32 %v2455_v54, %v717_v15 }
 0x1b5   : > { %v720_v19 = vpop.xlane.xlu0 %719  ;;  %v886_v37 = vsel %vm657_vm1, %v2582_v30, 0.0 }
 0x1b6   : > { %v2589_v40 = vpop.eup %2080  ;;  %2090 = vpow2.f32 %v822_v56  ;;  %v824_v51 = vmul.f32 1.442695, %v773_v17  ;;  %v774_v26 = vsub.f32 %v2469_v61, %v720_v19  ;;  %887 = vadd.xlane.f32.xlu0 %v886_v37  ;;  %884 = vadd.xlane.f32.xlu1 %v883_v22 }
 0x1b7   : > { %v723_v27 = vpop.xlane.xlu1 %722  ;;  %v889_v39 = vsel %vm657_vm1, %v2589_v40, 0.0 }
 0x1b8   : > { %v2592_v31 = vpop.eup %2082  ;;  %2092 = vpow2.f32 %v824_v51  ;;  %v826_v54 = vmul.f32 1.442695, %v774_v26  ;;  %v775_v33 = vsub.f32 %v2475_v0, %v723_v27 }
 0x1b9   : > { %v726_v35 = vpop.xlane.xlu0 %725  ;;  %v892_v36 = vsel %vm657_vm1, %v2592_v31, 0.0 }
 0x1ba   : > { %v2599_v38 = vpop.eup %2084  ;;  %2094 = vpow2.f32 %v826_v54  ;;  %v828_v61 = vmul.f32 1.442695, %v775_v33  ;;  %v776_v42 = vsub.f32 %v2465_v59, %v726_v35  ;;  %893 = vadd.xlane.f32.xlu0 %v892_v36  ;;  %890 = vadd.xlane.f32.xlu1 %v889_v39 }
 0x1bb   : > { %v729_v44 = vpop.xlane.xlu1 %728  ;;  %v895_v20 = vsel %vm657_vm1, %v2599_v38, 0.0 }
 0x1bc   : > { %v2602_v47 = vpop.eup %2086  ;;  %2096 = vpow2.f32 %v828_v61  ;;  %v830_v0 = vmul.f32 1.442695, %v776_v42  ;;  %v777_v49 = vsub.f32 %v2471_v62, %v729_v44 }
 0x1bd   : > { %v732_v45 = vpop.xlane.xlu0 %731  ;;  %v898_v52 = vsel %vm657_vm1, %v2602_v47, 0.0 }
 0x1be   : > { %v2609_v48 = vpop.eup %2088  ;;  %2098 = vpow2.f32 %v830_v0  ;;  %v832_v59 = vmul.f32 1.442695, %v777_v49  ;;  %v778_v21 = vsub.f32 %v2485_v5, %v732_v45  ;;  %899 = vadd.xlane.f32.xlu0 %v898_v52  ;;  %896 = vadd.xlane.f32.xlu1 %v895_v20 }
 0x1bf   : > { %v735_v57 = vpop.xlane.xlu1 %734  ;;  %v901_v1 = vsel %vm657_vm1, %v2609_v48, 0.0 }
 0x1c0   : > { %v2612_v58 = vpop.eup %2090  ;;  %2100 = vpow2.f32 %v832_v59  ;;  %v834_v62 = vmul.f32 1.442695, %v778_v21  ;;  %v779_v23 = vsub.f32 %v2491_v8, %v735_v57 }
 0x1c1   : > { %v738_v43 = vpop.xlane.xlu0 %737  ;;  %v904_v25 = vsel %vm657_vm1, %v2612_v58, 0.0 }
 0x1c2   : > { %v2619_v46 = vpop.eup %2092  ;;  %2102 = vpow2.f32 %v834_v62  ;;  %v836_v5 = vmul.f32 1.442695, %v779_v23  ;;  %v780_v29 = vsub.f32 %v2481_v3, %v738_v43  ;;  %905 = vadd.xlane.f32.xlu0 %v904_v25  ;;  %902 = vadd.xlane.f32.xlu1 %v901_v1  ;;  %v2680_v1 = vld [vmem:[%s2925_s4] sm:$0xff]  }
 0x1c3   : > { %v741_v32 = vpop.xlane.xlu1 %740  ;;  %v907_v15 = vsel %vm657_vm1, %v2619_v46, 0.0  ;;  %1943 = vmatprep.subr.bf16.mxu1 %v2680_v1 }
 0x1c4   : > { %v2622_v7 = vpop.eup %2094  ;;  %2104 = vpow2.f32 %v836_v5  ;;  %v838_v8 = vmul.f32 1.442695, %v780_v29  ;;  %v781_v9 = vsub.f32 %v2487_v6, %v741_v32 }
 0x1c5   : > { %v744_v53 = vpop.xlane.xlu0 %743  ;;  %v910_v12 = vsel %vm657_vm1, %v2622_v7, 0.0 }
 0x1c6   : > { %v2629_v56 = vpop.eup %2096  ;;  %2106 = vpow2.f32 %v838_v8  ;;  %v840_v3 = vmul.f32 1.442695, %v781_v9  ;;  %v782_v17 = vsub.f32 %v2501_v13, %v744_v53  ;;  %911 = vadd.xlane.f32.xlu0 %v910_v12  ;;  %908 = vadd.xlane.f32.xlu1 %v907_v15 }
 0x1c7   : > { %v747_v19 = vpop.xlane.xlu1 %746  ;;  %v913_v27 = vsel %vm657_vm1, %v2629_v56, 0.0 }
 0x1c8   : > { %v2632_v37 = vpop.eup %2098  ;;  %2108 = vpow2.f32 %v840_v3  ;;  %v842_v6 = vmul.f32 1.442695, %v782_v17  ;;  %v783_v22 = vsub.f32 %v2507_v16, %v747_v19 }
 0x1c9   : > { %v750_v51 = vpop.xlane.xlu0 %749  ;;  %v916_v26 = vsel %vm657_vm1, %v2632_v37, 0.0 }
 0x1ca   : > { %v2639_v54 = vpop.eup %2100  ;;  %2110 = vpow2.f32 %v842_v6  ;;  %v844_v13 = vmul.f32 1.442695, %v783_v22  ;;  %v784_v33 = vsub.f32 %v2497_v11, %v750_v51  ;;  %917 = vadd.xlane.f32.xlu0 %v916_v26  ;;  %914 = vadd.xlane.f32.xlu1 %v913_v27 }
 0x1cb   : > { %v753_v35 = vpop.xlane.xlu1 %752  ;;  %v919_v42 = vsel %vm657_vm1, %v2639_v54, 0.0 }
 0x1cc   : > { %v2642_v36 = vpop.eup %2102  ;;  %2112 = vpow2.f32 %v844_v13  ;;  %v846_v16 = vmul.f32 1.442695, %v784_v33  ;;  %v785_v39 = vsub.f32 %v2503_v14, %v753_v35 }
 0x1cd   : > { %v922_v61 = vsel %vm657_vm1, %v2642_v36, 0.0 }
 0x1ce   : > { %v2649_v44 = vpop.eup %2104  ;;  %2114 = vpow2.f32 %v846_v16  ;;  %v848_v0 = vmul.f32 1.442695, %v785_v39  ;;  %923 = vadd.xlane.f32.xlu0 %v922_v61  ;;  %920 = vadd.xlane.f32.xlu1 %v919_v42 }
 0x1cf   : > { %v925_v14 = vsel %vm657_vm1, %v2649_v44, 0.0 }
 0x1d0   : > { %v2651_v11 = vpop.eup %2106  ;;  %2116 = vpow2.f32 %v848_v0 }
 0x1d1   : > { %v928_v49 = vsel %vm657_vm1, %v2651_v11, 0.0 }
 0x1d2   : > { %v2657_v45 = vpop.eup %2108  ;;  %929 = vadd.xlane.f32.xlu0 %v928_v49  ;;  %926 = vadd.xlane.f32.xlu1 %v925_v14 }
 0x1d3   : > { %v931_v59 = vsel %vm657_vm1, %v2657_v45, 0.0 }
 0x1d4   : > { %v2659_v52 = vpop.eup %2110 }
 0x1d5   : > { %v934_v20 = vsel %vm657_vm1, %v2659_v52, 0.0 }
 0x1d6   : > { %v2665_v21 = vpop.eup %2112  ;;  %935 = vadd.xlane.f32.xlu0 %v934_v20  ;;  %932 = vadd.xlane.f32.xlu1 %v931_v59 }
 0x1d7   : > { %v937_v23 = vsel %vm657_vm1, %v2665_v21, 0.0 }
 0x1d8   : > { %v2667_v57 = vpop.eup %2114 }
 0x1d9   : > { %v940_v62 = vsel %vm657_vm1, %v2667_v57, 0.0 }
 0x1da   : > { %v2673_v43 = vpop.eup %2116  ;;  %941 = vadd.xlane.f32.xlu0 %v940_v62  ;;  %938 = vadd.xlane.f32.xlu1 %v937_v23 }
 0x1db   : > { %v943_v25 = vsel %vm657_vm1, %v2673_v43, 0.0 }
 0x1de   : > { %944 = vadd.xlane.f32.xlu1 %v943_v25 }
 0x22b   : > { %v852_v5 = vpop.xlane.xlu0 %851 }
 0x22c   : > { %2118 = vrcp.f32 %v852_v5 }
 0x22f   : > { %v858_v29 = vpop.xlane.xlu0 %857  ;;  %v855_v32 = vpop.xlane.xlu1 %854 }
 0x230   : > { %2120 = vrcp.f32 %v855_v32 }
 0x231   : > { %2122 = vrcp.f32 %v858_v29 }
 0x233   : > { %v864_v8 = vpop.xlane.xlu0 %863  ;;  %v861_v9 = vpop.xlane.xlu1 %860 }
 0x234   : > { %2124 = vrcp.f32 %v861_v9 }
 0x235   : > { %2126 = vrcp.f32 %v864_v8 }
 0x236   : > { %v2119_v15 = vpop.eup %2118 }
 0x237   : > { %v870_v53 = vpop.xlane.xlu0 %869  ;;  %v867_v12 = vpop.xlane.xlu1 %866  ;;  %v978_v6 = vmul.f32 %v2119_v15, %v2524_v63 }
 0x238   : > { %2128 = vrcp.f32 %v867_v12 }
 0x239   : > { %2130 = vrcp.f32 %v870_v53 }
 0x23a   : > { %v2121_v3 = vpop.eup %2120 }
 0x23b   : > { %v876_v17 = vpop.xlane.xlu0 %875  ;;  %v873_v19 = vpop.xlane.xlu1 %872  ;;  %v979_v22 = vmul.f32 %v2121_v3, %v2532_v28 }
 0x23c   : > { %v2123_v51 = vpop.eup %2122  ;;  %2132 = vrcp.f32 %v873_v19 }
 0x23d   : > { %v1010_v26 = vpack.c.bf16 %v979_v22, %v978_v6  ;;  %2134 = vrcp.f32 %v876_v17  ;;  %v980_v35 = vmul.f32 %v2123_v51, %v2529_v4 }
 0x23e   : > { %v2125_v27 = vpop.eup %2124 }
 0x23f   : > { %v882_v13 = vpop.xlane.xlu0 %881  ;;  %v879_v33 = vpop.xlane.xlu1 %878  ;;  %v981_v16 = vmul.f32 %v2125_v27, %v2539_v18  ;;  %1911 = vmatprep.mubr.msk.bf16.mxu0 %vm657_vm1, %v1010_v26 }
 0x240   : > { %v2127_v39 = vpop.eup %2126  ;;  %2136 = vrcp.f32 %v879_v33 }
 0x241   : > { %v1011_v61 = vpack.c.bf16 %v981_v16, %v980_v35  ;;  %2138 = vrcp.f32 %v882_v13  ;;  %v982_v0 = vmul.f32 %v2127_v39, %v2542_v24 }
 0x242   : > { %v2129_v42 = vpop.eup %2128 }
 0x243   : > { %v888_v63 = vpop.xlane.xlu0 %887  ;;  %v885_v28 = vpop.xlane.xlu1 %884  ;;  %1912 = vmatmul.mubr.msk.bf16.vlgmr.msra.gmra.mrb[32].mxu0 %vm657_vm1, %v1011_v61  ;;  %v983_v49 = vmul.f32 %v2129_v42, %v2549_v34 }
 0x244   : > { %v2131_v14 = vpop.eup %2130  ;;  %2140 = vrcp.f32 %v885_v28 }
 0x245   : > { %v1012_v4 = vpack.c.bf16 %v983_v49, %v982_v0  ;;  %2142 = vrcp.f32 %v888_v63  ;;  %v984_v62 = vmul.f32 %v2131_v14, %v2552_v41  ;;  %v2052_v0 = vld [vmem:[%s2925_s4 + $0x10] sm:$0xff]  }
 0x246   : > { %v2133_v20 = vpop.eup %2132 }
 0x247   : > { %v894_v18 = vpop.xlane.xlu0 %893  ;;  %v891_v59 = vpop.xlane.xlu1 %890  ;;  %1915 = vmatprep.mubr.msk.bf16.mxu0 %vm657_vm1, %v1012_v4  ;;  %v985_v23 = vmul.f32 %v2133_v20, %v2559_v50 }
 0x248   : > { %v2135_v25 = vpop.eup %2134  ;;  %2144 = vrcp.f32 %v891_v59 }
 0x249   : > { %v1013_v5 = vpack.c.bf16 %v985_v23, %v984_v62  ;;  %2146 = vrcp.f32 %v894_v18  ;;  %v986_v32 = vmul.f32 %v2135_v25, %v2562_v55  ;;  %v2053_v18 = vld [vmem:[%s2925_s4 + $0x18] sm:$0xff]  }
 0x24a   : > { %v2137_v29 = vpop.eup %2136 }
 0x24b   : > { %v900_v24 = vpop.xlane.xlu0 %899  ;;  %v897_v34 = vpop.xlane.xlu1 %896  ;;  %1916 = vmatmul.mubr.msk.bf16.gmra.mrb[36].mxu0 %vm657_vm1, %v1013_v5  ;;  %v987_v8 = vmul.f32 %v2137_v29, %v2569_v60 }
 0x24c   : > { %v2139_v9 = vpop.eup %2138  ;;  %2148 = vrcp.f32 %v897_v34 }
 0x24d   : > { %v1014_v53 = vpack.c.bf16 %v987_v8, %v986_v32  ;;  %2150 = vrcp.f32 %v900_v24  ;;  %v988_v15 = vmul.f32 %v2139_v9, %v2572_v2 }
 0x24e   : > { %v2141_v12 = vpop.eup %2140 }
 0x24f   : > { %v906_v41 = vpop.xlane.xlu0 %905  ;;  %v903_v50 = vpop.xlane.xlu1 %902  ;;  %1919 = vmatprep.mubr.msk.bf16.mxu0 %vm657_vm1, %v1014_v53  ;;  %v989_v3 = vmul.f32 %v2141_v12, %v2579_v10 }
 0x250   : > { %v2143_v17 = vpop.eup %2142  ;;  %2152 = vrcp.f32 %v903_v50 }
 0x251   : > { %v1015_v19 = vpack.c.bf16 %v989_v3, %v988_v15  ;;  %2154 = vrcp.f32 %v906_v41  ;;  %v990_v22 = vmul.f32 %v2143_v17, %v2582_v30  ;;  %v2051_v30 = vld [vmem:[%s2925_s4 + $0x8] sm:$0xff]  }
 0x252   : > { %v2145_v6 = vpop.eup %2144 }
 0x253   : > { %v912_v55 = vpop.xlane.xlu0 %911  ;;  %v909_v60 = vpop.xlane.xlu1 %908  ;;  %1920 = vmatmul.mubr.msk.bf16.gmra.mrb[40].mxu0 %vm657_vm1, %v1015_v19  ;;  %v991_v51 = vmul.f32 %v2145_v6, %v2589_v40 }
 0x254   : > { %v2147_v26 = vpop.eup %2146  ;;  %2156 = vrcp.f32 %v909_v60 }
 0x255   : > { %v1016_v27 = vpack.c.bf16 %v991_v51, %v990_v22  ;;  %2158 = vrcp.f32 %v912_v55  ;;  %v992_v33 = vmul.f32 %v2147_v26, %v2592_v31 }
 0x256   : > { %v2149_v13 = vpop.eup %2148 }
 0x257   : > { %v918_v2 = vpop.xlane.xlu0 %917  ;;  %v915_v10 = vpop.xlane.xlu1 %914  ;;  %1923 = vmatprep.mubr.msk.bf16.mxu1 %vm657_vm1, %v1016_v27  ;;  %v993_v35 = vmul.f32 %v2149_v13, %v2599_v38 }
 0x258   : > { %v2151_v16 = vpop.eup %2150  ;;  %2160 = vrcp.f32 %v915_v10 }
 0x259   : > { %v1017_v39 = vpack.c.bf16 %v993_v35, %v992_v33  ;;  %2162 = vrcp.f32 %v918_v2  ;;  %v994_v63 = vmul.f32 %v2151_v16, %v2602_v47 }
 0x25a   : > { %v2153_v40 = vpop.eup %2152 }
 0x25b   : > { %v924_v61 = vpop.xlane.xlu0 %923  ;;  %v921_v42 = vpop.xlane.xlu1 %920  ;;  %1924 = vmatmul.mubr.msk.bf16.vlgmr.msra.gmra.mrb[0].mxu1 %vm657_vm1, %v1017_v39  ;;  %v995_v28 = vmul.f32 %v2153_v40, %v2609_v48 }
 0x25c   : > { %v2155_v31 = vpop.eup %2154  ;;  %2164 = vrcp.f32 %v921_v42  ;;  %1944 = vmatpush3.bf16.msra.mxu1 %v2680_v1 }
 0x25d   : > { %v1018_v38 = vpack.c.bf16 %v995_v28, %v994_v63  ;;  %1945 = vmatprep.subr.bf16.mxu1 %v2051_v30  ;;  %2166 = vrcp.f32 %v924_v61  ;;  %v996_v47 = vmul.f32 %v2155_v31, %v2612_v58 }
 0x25e   : > { %v2157_v49 = vpop.eup %2156 }
 0x25f   : > { %v930_v14 = vpop.xlane.xlu0 %929  ;;  %v927_v4 = vpop.xlane.xlu1 %926  ;;  %1927 = vmatprep.mubr.msk.bf16.mxu1 %vm657_vm1, %v1018_v38  ;;  %v997_v48 = vmul.f32 %v2157_v49, %v2619_v46 }
 0x260   : > { %v2159_v20 = vpop.eup %2158  ;;  %2168 = vrcp.f32 %v927_v4  ;;  %1946 = vmatpush3.bf16.msra.mxu1 %v2051_v30 }
 0x261   : > { %v1019_v1 = vpack.c.bf16 %v997_v48, %v996_v47  ;;  %1947 = vmatprep.subr.bf16.mxu1 %v2052_v0  ;;  %2170 = vrcp.f32 %v930_v14  ;;  %v998_v25 = vmul.f32 %v2159_v20, %v2622_v7 }
 0x262   : > { %v2161_v59 = vpop.eup %2160 }
 0x263   : > { %v936_v62 = vpop.xlane.xlu0 %935  ;;  %v933_v23 = vpop.xlane.xlu1 %932  ;;  %1928 = vmatmul.mubr.msk.bf16.gmra.mrb[4].mxu1 %vm657_vm1, %v1019_v1  ;;  %v999_v58 = vmul.f32 %v2161_v59, %v2629_v56 }
 0x264   : > { %v2163_v46 = vpop.eup %2162  ;;  %2172 = vrcp.f32 %v933_v23  ;;  %1948 = vmatpush3.bf16.msra.mxu1 %v2052_v0 }
 0x265   : > { %v1020_v5 = vpack.c.bf16 %v999_v58, %v998_v25  ;;  %1949 = vmatprep.subr.bf16.mxu1 %v2053_v18  ;;  %2174 = vrcp.f32 %v936_v62  ;;  %v1000_v32 = vmul.f32 %v2163_v46, %v2632_v37 }
 0x266   : > { %v2165_v29 = vpop.eup %2164 }
 0x267   : > { %v942_v24 = vpop.xlane.xlu0 %941  ;;  %v939_v34 = vpop.xlane.xlu1 %938  ;;  %1931 = vmatprep.mubr.msk.bf16.mxu1 %vm657_vm1, %v1020_v5  ;;  %v1001_v8 = vmul.f32 %v2165_v29, %v2639_v54 }
 0x268   : > { %v2167_v9 = vpop.eup %2166  ;;  %2176 = vrcp.f32 %v939_v34  ;;  %1950 = vmatpush3.bf16.msra.mxu1 %v2053_v18 }
 0x269   : > { %2178 = vrcp.f32 %v942_v24  ;;  %v1021_v7 = vpack.c.bf16 %v1001_v8, %v1000_v32  ;;  %v1002_v12 = vmul.f32 %v2167_v9, %v2642_v36 }
 0x26a   : > { %v2169_v56 = vpop.eup %2168 }
 0x26b   : > { %v945_v53 = vpop.xlane.xlu1 %944  ;;  %1932 = vmatmul.mubr.msk.bf16.gmra.mrb[8].mxu1 %vm657_vm1, %v1021_v7  ;;  %v1003_v41 = vmul.f32 %v2169_v56, %v2649_v44  ;;  %v2171_v50 = vpop.eup %2170 }
 0x26c   : > { %2180 = vrcp.f32 %v945_v53  ;;  %v1004_v37 = vmul.f32 %v2171_v50, %v2651_v11  ;;  %v2767_v50 = vld [vmem:[%s2926_s5] ss:$0 sm:$0xff] }
 0x26d   : > { %v1022_v15 = vpack.c.bf16 %v1003_v41, %v1002_v12 }
 0x26e   : > { %v2173_v3 = vpop.eup %2172 }
 0x26f   : > { %1935 = vmatprep.mubr.msk.bf16.mxu1 %vm657_vm1, %v1022_v15  ;;  %v1005_v54 = vmul.f32 %v2173_v3, %v2657_v45  ;;  %v2175_v17 = vpop.eup %2174  ;;  %v1513_v3 = vld [vmem:[%s2762_s19 + $0x10] sm:$0xff] }
 0x270   : > { %v1006_v60 = vmul.f32 %v2175_v17, %v2659_v52  ;;  %v1511_v17 = vld [vmem:[%s2762_s19] sm:$0xff] }
 0x271   : > { %v1023_v19 = vpack.c.bf16 %v1005_v54, %v1004_v37 }
 0x272   : > { %v2177_v6 = vpop.eup %2176 }
 0x273   : > { %v2179_v55 = vpop.eup %2178  ;;  %1936 = vmatmul.mubr.msk.bf16.gmra.mrb[12].mxu1 %vm657_vm1, %v1023_v19  ;;  %v1007_v36 = vmul.f32 %v2177_v6, %v2665_v21 }
 0x274   : > { %v1008_v51 = vmul.f32 %v2179_v55, %v2667_v57  ;;  %v1514_v55 = vld [vmem:[%s2762_s19 + $0x18] sm:$0xff] }
 0x275   : > { %v1024_v22 = vpack.c.bf16 %v1007_v36, %v1006_v60 }
 0x276   : > { %v2181_v44 = vpop.eup %2180 }
 0x277   : > { %v1009_v26 = vmul.f32 %v2181_v44, %v2673_v43  ;;  %1939 = vmatprep.mubr.msk.bf16.mxu1 %vm657_vm1, %v1024_v22  ;;  %v1512_v22 = vld [vmem:[%s2762_s19 + $0x8] sm:$0xff] }
 0x279   : > { %v1025_v11 = vpack.c.bf16 %v1009_v26, %v1008_v51 }
 0x27b   : > { %1940 = vmatmul.mubr.msk.bf16.gmra.mrb[16].mxu1 %vm657_vm1, %v1025_v11 }
 0x316   : > { %v1913_v45 = vpop.f32.mrb[32].mxu0 }
 0x317   : > { %v1120_v27 = vpop.f32.mrb[33].mxu0 }
 0x318   : > { %v1914_v13 = vpop.f32.mrb[34].mxu0 }
 0x319   : > { %v1248_v2 = vpack.c.bf16 %v1914_v13, %v1913_v45  ;;  %v1123_v10 = vpop.f32.mrb[35].mxu0  ;;  %v1517_v13 = vld [vmem:[%s2762_s19 + $0x30] sm:$0xff] }
 0x31a   : > { %v1247_v33 = vpack.c.bf16 %v1123_v10, %v1120_v27 }
 0x31c   : > { %1951 = vmatprep.mubr.msk.bf16.mxu1 %vm441_vm0, %v1247_v33  ;;  %v1515_v33 = vld [vmem:[%s2762_s19 + $0x20] sm:$0xff] }
 0x31d   : > { %1952 = vmatmul.mubr.msk.bf16.vlgmr.msra.gmra.mrb[20].mxu1 %vm441_vm0, %v1248_v2 }
 0x31e   : > { %v1917_v52 = vpop.f32.mrb[36].mxu0 }
 0x31f   : > { %v1136_v21 = vpop.f32.mrb[37].mxu0 }
 0x320   : > { %v1918_v57 = vpop.f32.mrb[38].mxu0 }
 0x321   : > { %v1250_v35 = vpack.c.bf16 %v1918_v57, %v1917_v52  ;;  %v1139_v43 = vpop.f32.mrb[39].mxu0  ;;  %v1518_v57 = vld [vmem:[%s2762_s19 + $0x38] sm:$0xff] }
 0x322   : > { %v1249_v16 = vpack.c.bf16 %v1139_v43, %v1136_v21 }
 0x324   : > { %1955 = vmatprep.mubr.msk.bf16.mxu1 %vm441_vm0, %v1249_v16 }
 0x325   : > { %1956 = vmatmul.mubr.msk.bf16.gmra.mrb[24].mxu1 %vm441_vm0, %v1250_v35 }
 0x326   : > { %v1921_v39 = vpop.f32.mrb[40].mxu0 }
 0x327   : > { %v1152_v30 = vpop.f32.mrb[41].mxu0 }
 0x328   : > { %v1922_v40 = vpop.f32.mrb[42].mxu0 }
 0x329   : > { %v1252_v61 = vpack.c.bf16 %v1922_v40, %v1921_v39  ;;  %v1155_v42 = vpop.f32.mrb[43].mxu0  ;;  %v1516_v39 = vld [vmem:[%s2762_s19 + $0x28] sm:$0xff] }
 0x32a   : > { %v1251_v63 = vpack.c.bf16 %v1155_v42, %v1152_v30 }
 0x32c   : > { %1959 = vmatprep.mubr.msk.bf16.mxu1 %vm441_vm0, %v1251_v63 }
 0x32d   : > { %1960 = vmatmul.mubr.msk.bf16.gmra.mrb[28].mxu1 %vm441_vm0, %v1252_v61 }
 0x32e   : > { %v1925_v28 = vpop.f32.mrb[0].mxu1 }
 0x32f   : > { %v1168_v31 = vpop.f32.mrb[1].mxu1 }
 0x330   : > { %v1926_v38 = vpop.f32.mrb[2].mxu1 }
 0x331   : > { %v1254_v0 = vpack.c.bf16 %v1926_v38, %v1925_v28  ;;  %v1171_v49 = vpop.f32.mrb[3].mxu1  ;;  %v1521_v28 = vld [vmem:[%s2762_s19 + $0x50] sm:$0xff] }
 0x332   : > { %v1253_v14 = vpack.c.bf16 %v1171_v49, %v1168_v31 }
 0x334   : > { %1963 = vmatprep.mubr.msk.bf16.mxu1 %vm441_vm0, %v1253_v14 }
 0x335   : > { %1964 = vmatmul.mubr.msk.bf16.gmra.mrb[32].mxu1 %vm441_vm0, %v1254_v0  ;;  %v1519_v0 = vld [vmem:[%s2762_s19 + $0x40] sm:$0xff] }
 0x336   : > { %v1929_v4 = vpop.f32.mrb[4].mxu1 }
 0x337   : > { %v1184_v47 = vpop.f32.mrb[5].mxu1 }
 0x338   : > { %v1930_v48 = vpop.f32.mrb[6].mxu1 }
 0x339   : > { %v1256_v20 = vpack.c.bf16 %v1930_v48, %v1929_v4  ;;  %v1187_v1 = vpop.f32.mrb[7].mxu1  ;;  %v1522_v4 = vld [vmem:[%s2762_s19 + $0x58] sm:$0xff] }
 0x33a   : > { %v1255_v18 = vpack.c.bf16 %v1187_v1, %v1184_v47  ;;  %v1520_v1 = vld [vmem:[%s2762_s19 + $0x48] sm:$0xff] }
 0x33c   : > { %1967 = vmatprep.mubr.msk.bf16.mxu1 %vm441_vm0, %v1255_v18 }
 0x33d   : > { %1968 = vmatmul.mubr.msk.bf16.gmra.mrb[36].mxu1 %vm441_vm0, %v1256_v20 }
 0x33e   : > { %v1933_v59 = vpop.f32.mrb[8].mxu1 }
 0x33f   : > { %v1200_v62 = vpop.f32.mrb[9].mxu1 }
 0x340   : > { %v1934_v23 = vpop.f32.mrb[10].mxu1 }
 0x341   : > { %v1258_v25 = vpack.c.bf16 %v1934_v23, %v1933_v59  ;;  %v1203_v58 = vpop.f32.mrb[11].mxu1 }
 0x342   : > { %v1257_v46 = vpack.c.bf16 %v1203_v58, %v1200_v62  ;;  %v1525_v58 = vld [vmem:[%s2762_s19 + $0x70] sm:$0xff] }
 0x344   : > { %1971 = vmatprep.mubr.msk.bf16.mxu1 %vm441_vm0, %v1257_v46 }
 0x345   : > { %1972 = vmatmul.mubr.msk.bf16.gmra.mrb[40].mxu1 %vm441_vm0, %v1258_v25 }
 0x346   : > { %v1937_v5 = vpop.f32.mrb[12].mxu1 }
 0x347   : > { %v1216_v29 = vpop.f32.mrb[13].mxu1 }
 0x348   : > { %v1938_v24 = vpop.f32.mrb[14].mxu1 }
 0x349   : > { %v1260_v34 = vpack.c.bf16 %v1938_v24, %v1937_v5  ;;  %v1219_v32 = vpop.f32.mrb[15].mxu1 }
 0x34a   : > { %v1259_v8 = vpack.c.bf16 %v1219_v32, %v1216_v29  ;;  %v1523_v29 = vld [vmem:[%s2762_s19 + $0x60] sm:$0xff]  ;;  %v1526_v32 = vld [vmem:[%s2762_s19 + $0x78] sm:$0xff] }
 0x34c   : > { %1975 = vmatprep.mubr.msk.bf16.mxu1 %vm441_vm0, %v1259_v8 }
 0x34d   : > { %1976 = vmatmul.mubr.msk.bf16.gmra.mrb[44].mxu1 %vm441_vm0, %v1260_v34 }
 0x34e   : > { %v1941_v9 = vpop.f32.mrb[16].mxu1 }
 0x34f   : > { %v1232_v7 = vpop.f32.mrb[17].mxu1 }
 0x350   : > { %v1942_v56 = vpop.f32.mrb[18].mxu1 }
 0x351   : > { %v1262_v53 = vpack.c.bf16 %v1942_v56, %v1941_v9  ;;  %v1235_v12 = vpop.f32.mrb[19].mxu1  ;;  %v1524_v56 = vld [vmem:[%s2762_s19 + $0x68] sm:$0xff] }
 0x352   : > { %v1261_v41 = vpack.c.bf16 %v1235_v12, %v1232_v7 }
 0x354   : > { %1979 = vmatprep.mubr.msk.bf16.mxu1 %vm441_vm0, %v1261_v41 }
 0x355   : > { %1980 = vmatmul.mubr.msk.bf16.gmra.mrb[48].mxu1 %vm441_vm0, %v1262_v53 }
 0x3f0   : > { %v1953_v15 = vpop.f32.mrb[20].mxu1 }
 0x3f1   : > { %v1393_v37 = vadd.f32 %v1953_v15, %v2767_v50  ;;  %v1384_v54 = vpop.f32.mrb[21].mxu1 }
 0x3f2   : > { %v1385_v19 = vadd.f32 %v2767_v50, %v1384_v54  ;;  %v1954_v6 = vpop.f32.mrb[22].mxu1 }
 0x3f3   : > { %v1545_v60 = vadd.f32 %v1513_v3, %v1393_v37  ;;  %v1396_v36 = vadd.f32 %v1954_v6, %v2767_v50  ;;  %v1387_v44 = vpop.f32.mrb[23].mxu1  ;;  %v1529_v37 = vld [vmem:[%s2762_s19 + $0x90] sm:$0xff] }
 0x3f4   : > { %v1543_v51 = vadd.f32 %v1511_v17, %v1385_v19  ;;  %v1388_v26 = vadd.f32 %v2767_v50, %v1387_v44  ;;  %v1527_v19 = vld [vmem:[%s2762_s19 + $0x80] sm:$0xff] }
 0x3f5   : > { %1577 = vst [vmem:[%s2779_s9 + $0x10] sm:$0xff] %v1545_v60  ;;  %v1546_v11 = vadd.f32 %v1514_v55, %v1396_v36  ;;  %v1530_v60 = vld [vmem:[%s2762_s19 + $0x98] sm:$0xff] }
 0x3f6   : > { %1575 = vst [vmem:[%s2779_s9] sm:$0xff] %v1543_v51  ;;  %v1544_v45 = vadd.f32 %v1512_v22, %v1388_v26  ;;  %v1528_v51 = vld [vmem:[%s2762_s19 + $0x88] sm:$0xff] }
 0x3f7   : > { %1578 = vst [vmem:[%s2779_s9 + $0x18] sm:$0xff] %v1546_v11 }
 0x3f8   : > { %1576 = vst [vmem:[%s2779_s9 + $0x8] sm:$0xff] %v1544_v45  ;;  %v1957_v27 = vpop.f32.mrb[24].mxu1 }
 0x3f9   : > { %v1409_v2 = vadd.f32 %v1957_v27, %v2767_v50  ;;  %v1400_v10 = vpop.f32.mrb[25].mxu1 }
 0x3fa   : > { %v1401_v52 = vadd.f32 %v2767_v50, %v1400_v10  ;;  %v1958_v21 = vpop.f32.mrb[26].mxu1 }
 0x3fb   : > { %v1549_v35 = vadd.f32 %v1517_v13, %v1409_v2  ;;  %v1412_v43 = vadd.f32 %v1958_v21, %v2767_v50  ;;  %v1403_v16 = vpop.f32.mrb[27].mxu1  ;;  %v1533_v2 = vld [vmem:[%s2762_s19 + $0xb0] sm:$0xff] }
 0x3fc   : > { %v1547_v30 = vadd.f32 %v1515_v33, %v1401_v52  ;;  %v1404_v40 = vadd.f32 %v2767_v50, %v1403_v16  ;;  %v1531_v52 = vld [vmem:[%s2762_s19 + $0xa0] sm:$0xff] }
 0x3fd   : > { %1581 = vst [vmem:[%s2779_s9 + $0x30] sm:$0xff] %v1549_v35  ;;  %v1550_v61 = vadd.f32 %v1518_v57, %v1412_v43  ;;  %v1534_v35 = vld [vmem:[%s2762_s19 + $0xb8] sm:$0xff] }
 0x3fe   : > { %1579 = vst [vmem:[%s2779_s9 + $0x20] sm:$0xff] %v1547_v30  ;;  %v1548_v42 = vadd.f32 %v1516_v39, %v1404_v40  ;;  %v1532_v30 = vld [vmem:[%s2762_s19 + $0xa8] sm:$0xff] }
 0x3ff   : > { %1582 = vst [vmem:[%s2779_s9 + $0x38] sm:$0xff] %v1550_v61 }
 0x400   : > { %1580 = vst [vmem:[%s2779_s9 + $0x28] sm:$0xff] %v1548_v42  ;;  %v1961_v63 = vpop.f32.mrb[28].mxu1 }
 0x401   : > { %v1425_v31 = vadd.f32 %v1961_v63, %v2767_v50  ;;  %v1416_v38 = vpop.f32.mrb[29].mxu1 }
 0x402   : > { %v1417_v49 = vadd.f32 %v2767_v50, %v1416_v38  ;;  %v1962_v14 = vpop.f32.mrb[30].mxu1 }
 0x403   : > { %v1553_v47 = vadd.f32 %v1521_v28, %v1425_v31  ;;  %v1428_v48 = vadd.f32 %v1962_v14, %v2767_v50  ;;  %v1419_v20 = vpop.f32.mrb[31].mxu1  ;;  %v1537_v31 = vld [vmem:[%s2762_s19 + $0xd0] sm:$0xff] }
 0x404   : > { %v1551_v18 = vadd.f32 %v1519_v0, %v1417_v49  ;;  %v1420_v59 = vadd.f32 %v2767_v50, %v1419_v20  ;;  %v1535_v49 = vld [vmem:[%s2762_s19 + $0xc0] sm:$0xff] }
 0x405   : > { %1585 = vst [vmem:[%s2779_s9 + $0x50] sm:$0xff] %v1553_v47  ;;  %v1554_v62 = vadd.f32 %v1522_v4, %v1428_v48  ;;  %v1538_v47 = vld [vmem:[%s2762_s19 + $0xd8] sm:$0xff] }
 0x406   : > { %1583 = vst [vmem:[%s2779_s9 + $0x40] sm:$0xff] %v1551_v18  ;;  %v1552_v23 = vadd.f32 %v1520_v1, %v1420_v59  ;;  %v1536_v18 = vld [vmem:[%s2762_s19 + $0xc8] sm:$0xff] }
 0x407   : > { %1586 = vst [vmem:[%s2779_s9 + $0x58] sm:$0xff] %v1554_v62 }
 0x408   : > { %1584 = vst [vmem:[%s2779_s9 + $0x48] sm:$0xff] %v1552_v23  ;;  %v1965_v25 = vpop.f32.mrb[32].mxu1 }
 0x409   : > { %v1441_v46 = vadd.f32 %v1965_v25, %v2767_v50  ;;  %v1432_v5 = vpop.f32.mrb[33].mxu1 }
 0x40a   : > { %v1433_v24 = vadd.f32 %v2767_v50, %v1432_v5  ;;  %v1966_v34 = vpop.f32.mrb[34].mxu1 }
 0x40b   : > { %v1557_v8 = vadd.f32 %v1525_v58, %v1441_v46  ;;  %v1444_v9 = vadd.f32 %v1966_v34, %v2767_v50  ;;  %v1435_v7 = vpop.f32.mrb[35].mxu1  ;;  %v1541_v46 = vld [vmem:[%s2762_s19 + $0xf0] sm:$0xff] }
 0x40c   : > { %v1555_v53 = vadd.f32 %v1523_v29, %v1433_v24  ;;  %v1436_v12 = vadd.f32 %v2767_v50, %v1435_v7  ;;  %v1539_v24 = vld [vmem:[%s2762_s19 + $0xe0] sm:$0xff] }
 0x40d   : > { %1589 = vst [vmem:[%s2779_s9 + $0x70] sm:$0xff] %v1557_v8  ;;  %v1558_v41 = vadd.f32 %v1526_v32, %v1444_v9  ;;  %v1542_v8 = vld [vmem:[%s2762_s19 + $0xf8] sm:$0xff] }
 0x40e   : > { %1587 = vst [vmem:[%s2779_s9 + $0x60] sm:$0xff] %v1555_v53  ;;  %v1556_v15 = vadd.f32 %v1524_v56, %v1436_v12  ;;  %v1540_v53 = vld [vmem:[%s2762_s19 + $0xe8] sm:$0xff] }
 0x40f   : > { %1590 = vst [vmem:[%s2779_s9 + $0x78] sm:$0xff] %v1558_v41 }
 0x410   : > { %1588 = vst [vmem:[%s2779_s9 + $0x68] sm:$0xff] %v1556_v15  ;;  %v1969_v3 = vpop.f32.mrb[36].mxu1 }
 0x411   : > { %v1457_v54 = vadd.f32 %v1969_v3, %v2767_v50  ;;  %v1448_v17 = vpop.f32.mrb[37].mxu1 }
 0x412   : > { %v1449_v6 = vadd.f32 %v2767_v50, %v1448_v17  ;;  %v1970_v55 = vpop.f32.mrb[38].mxu1 }
 0x413   : > { %v1561_v36 = vadd.f32 %v1529_v37, %v1457_v54  ;;  %v1460_v44 = vadd.f32 %v1970_v55, %v2767_v50  ;;  %v1451_v22 = vpop.f32.mrb[39].mxu1 }
 0x414   : > { %v1559_v26 = vadd.f32 %v1527_v19, %v1449_v6  ;;  %v1452_v11 = vadd.f32 %v2767_v50, %v1451_v22 }
 0x415   : > { %1593 = vst [vmem:[%s2779_s9 + $0x90] sm:$0xff] %v1561_v36  ;;  %v1562_v45 = vadd.f32 %v1530_v60, %v1460_v44 }
 0x416   : > { %1591 = vst [vmem:[%s2779_s9 + $0x80] sm:$0xff] %v1559_v26  ;;  %v1560_v27 = vadd.f32 %v1528_v51, %v1452_v11 }
 0x417   : > { %1594 = vst [vmem:[%s2779_s9 + $0x98] sm:$0xff] %v1562_v45 }
 0x418   : > { %1592 = vst [vmem:[%s2779_s9 + $0x88] sm:$0xff] %v1560_v27  ;;  %v1973_v13 = vpop.f32.mrb[40].mxu1 }
 0x419   : > { %v1473_v10 = vadd.f32 %v1973_v13, %v2767_v50  ;;  %v1464_v33 = vpop.f32.mrb[41].mxu1 }
 0x41a   : > { %v1465_v21 = vadd.f32 %v2767_v50, %v1464_v33  ;;  %v1974_v57 = vpop.f32.mrb[42].mxu1 }
 0x41b   : > { %v1565_v43 = vadd.f32 %v1533_v2, %v1473_v10  ;;  %v1476_v16 = vadd.f32 %v1974_v57, %v2767_v50  ;;  %v1467_v39 = vpop.f32.mrb[43].mxu1 }
 0x41c   : > { %v1563_v40 = vadd.f32 %v1531_v52, %v1465_v21  ;;  %v1468_v61 = vadd.f32 %v2767_v50, %v1467_v39 }
 0x41d   : > { %1597 = vst [vmem:[%s2779_s9 + $0xb0] sm:$0xff] %v1565_v43  ;;  %v1566_v42 = vadd.f32 %v1534_v35, %v1476_v16 }
 0x41e   : > { %1595 = vst [vmem:[%s2779_s9 + $0xa0] sm:$0xff] %v1563_v40  ;;  %v1564_v63 = vadd.f32 %v1532_v30, %v1468_v61 }
 0x41f   : > { %1598 = vst [vmem:[%s2779_s9 + $0xb8] sm:$0xff] %v1566_v42 }
 0x420   : > { %1596 = vst [vmem:[%s2779_s9 + $0xa8] sm:$0xff] %v1564_v63  ;;  %v1977_v28 = vpop.f32.mrb[44].mxu1 }
 0x421   : > { %v1489_v38 = vadd.f32 %v1977_v28, %v2767_v50  ;;  %v1480_v0 = vpop.f32.mrb[45].mxu1 }
 0x422   : > { %v1481_v14 = vadd.f32 %v2767_v50, %v1480_v0  ;;  %v1978_v4 = vpop.f32.mrb[46].mxu1 }
 0x423   : > { %v1569_v48 = vadd.f32 %v1537_v31, %v1489_v38  ;;  %v1492_v20 = vadd.f32 %v1978_v4, %v2767_v50  ;;  %v1483_v1 = vpop.f32.mrb[47].mxu1 }
 0x424   : > { %v1567_v59 = vadd.f32 %v1535_v49, %v1481_v14  ;;  %v1484_v62 = vadd.f32 %v2767_v50, %v1483_v1 }
 0x425   : > { %1601 = vst [vmem:[%s2779_s9 + $0xd0] sm:$0xff] %v1569_v48  ;;  %v1570_v23 = vadd.f32 %v1538_v47, %v1492_v20 }
 0x426   : > { %1599 = vst [vmem:[%s2779_s9 + $0xc0] sm:$0xff] %v1567_v59  ;;  %v1568_v25 = vadd.f32 %v1536_v18, %v1484_v62 }
 0x427   : > { %1602 = vst [vmem:[%s2779_s9 + $0xd8] sm:$0xff] %v1570_v23 }
 0x428   : > { %1600 = vst [vmem:[%s2779_s9 + $0xc8] sm:$0xff] %v1568_v25  ;;  %v1981_v58 = vpop.f32.mrb[48].mxu1 }
 0x429   : > { %v1505_v5 = vadd.f32 %v1981_v58, %v2767_v50  ;;  %v1496_v29 = vpop.f32.mrb[49].mxu1 }
 0x42a   : > { %v1497_v34 = vadd.f32 %v2767_v50, %v1496_v29  ;;  %v1982_v32 = vpop.f32.mrb[50].mxu1 }
 0x42b   : > { %v1573_v9 = vadd.f32 %v1541_v46, %v1505_v5  ;;  %v1508_v7 = vadd.f32 %v1982_v32, %v2767_v50  ;;  %v1499_v56 = vpop.f32.mrb[51].mxu1 }
 0x42c   : > { %v1571_v12 = vadd.f32 %v1539_v24, %v1497_v34  ;;  %v1500_v41 = vadd.f32 %v2767_v50, %v1499_v56 }
 0x42d   : > { %1605 = vst [vmem:[%s2779_s9 + $0xf0] sm:$0xff] %v1573_v9  ;;  %v1574_v15 = vadd.f32 %v1542_v8, %v1508_v7 }
 0x42e   : > { %1603 = vst [vmem:[%s2779_s9 + $0xe0] sm:$0xff] %v1571_v12  ;;  %v1572_v3 = vadd.f32 %v1540_v53, %v1500_v41 }
 0x42f   : > { %1606 = vst [vmem:[%s2779_s9 + $0xf8] sm:$0xff] %v1574_v15 }
 0x430   : > { %1604 = vst [vmem:[%s2779_s9 + $0xe8] sm:$0xff] %v1572_v3 }
 0x431   : > { %2195 = shalt.err (!%p2192_p3)
}
 0x432   : > { %s2196_s16 = scalar_lea.hbm %s2871_s13, 4096  ;;  %s2200_s26 = scalar_lea.hbm %s2927_s6, 8192 }
 0x433   : > { %p2197_p4 = scmp.ne.s32.totalorder %s2871_s13, %s2196_s16  ;;  %p2201_p9 = scmp.lt.u32.totalorder %s2871_s13, %s2927_s6 }
 0x434   : > { %p2202_p10 = scmp.lt.u32.totalorder %s2200_s26, %s2196_s16  ;;  %p2204_p12 = scmp.lt.u32.totalorder %s2196_s16, %s2871_s13 }
 0x435   : > { %p2198_p7 = pnand %p2197_p4, %p2322_p5 }
 0x436   : > { %p2203_p11 = por %p2202_p10, %p2201_p9 }
 0x437   : > { %p2199_p8 = pneg %p2198_p7 }
 0x438   : > { %p2205_p13 = por %p2204_p12, %p2203_p11 }
 0x43a   : > { %p2206_p0 = pnand %p2205_p13, %p2199_p8 }
 0x43c   : > { %2209 = shalt.err (!%p2206_p0)
}
 0x43d   : > { %s2247_s29 = smov 128   ;;  %s2248_s11 = smov 8  }
 0x43e   : > { %1989 = dma.vmem_to_hbm [thread:$0]  (%p2322_p5), %s2873_s10, 4096, %s2871_s13, %s2880_s25, %s2247_s29, %s2247_s29, %s2248_s11  }
 0x43f PF: > { %p1995_p1 = scmp.ge.s32.totalorder %s2244_s24, 2  ;;  %s1636_s12 = sand.u32 1, %s2232_s21  }
 0x440   : > { %s1637_s14 = scalar_lea.sflag [#allocation3], %s1636_s12 }
 0x441   : > { %p1992_p2 = pnand %p1995_p1, %p2326_p6 }
 0x443   : > { %2227 = dma.done.wait (!%p1992_p2), %s1637_s14, 4096  }
 0x444   : > { %2229 = vsyncadd (!%p1992_p2), %s1637_s14, 4294963200  ;;  %p16_p3 = scmp.ge.s32.totalorder %s2309_s27, 4   ;;  %s2930_s21 = smov %s2236_s22 }
 0x445   : > { %s2931_s22 = smov %s2240_s23  ;;  %s2932_s23 = smov %s2320_s30 }
 0x446   : > { %s2933_s24 = smov %s2309_s27  ;;  %18 = sbr.rel (!%p16_p3) target bundleno = 3 (0x3), region = 88 }
 0x44d   :  { %1642 = vsyncpa [#allocation3], 1 }
 0x44e   :  { %1644 = vsyncpa [#allocation3 + $0x1], 1 }

</bundles_post_ra>
